<compile_context>
chip_gen: v7x
topology: tpu7x:2x2x1
jax: 0.10.0
libtpu: 0.0.40
codegen_flags: <defaults>
</compile_context>

<pallas_src>
import functools

import jax
import jax.numpy as jnp
from jax.experimental import pallas as pl
from jax.experimental.pallas import tpu as pltpu


def _round_up(x, m):
    return (x + m - 1) // m * m


def _mlp_kernel(x_ref, w1_ref, b1_ref, w2_ref, b2_ref, w3_ref, b3_ref,
                o_ref, acc_ref):
    """Grid: (K_tiles,) reduction over the flattened input dimension.

    Streams bf16 (B, TK) x (TK, H) tiles through the MXU, accumulating layer-1
    pre-activations in a resident f32 scratch; layers 2/3 run in the epilogue.
    """
    k = pl.program_id(0)

    @pl.when(k == 0)
    def _():
        acc_ref[...] = jnp.zeros_like(acc_ref)

    # Layer 1 partial: streaming matmul-accumulate (bf16 inputs, f32 accumulate).
    acc_ref[...] += jnp.dot(x_ref[...], w1_ref[...],
                            preferred_element_type=jnp.float32)

    @pl.when(k == pl.num_programs(0) - 1)
    def _():
        # Layer 1 finalize: bias + ReLU.
        h1 = jnp.maximum(acc_ref[...] + b1_ref[...], 0.0)
        # Layer 2: Linear + ReLU (small, fully resident, f32).
        h2 = jnp.dot(h1, w2_ref[...], preferred_element_type=jnp.float32)
        h2 = jnp.maximum(h2 + b2_ref[...], 0.0)
        # Layer 3: Linear (logits).
        logits = jnp.dot(h2, w3_ref[...], preferred_element_type=jnp.float32)
        o_ref[...] = (logits + b3_ref[...]).astype(o_ref.dtype)


@functools.partial(jax.jit, static_argnames=("tk",))
def neural_network_forward(x_nchw, w1, b1, w2, b2, w3, b3, *, tk=512):
    """x_nchw: (B, C, H, W) float32.  Weights stored (in, out); biases (1, out).

    Returns logits (B, out_features).  `tk` is the K-tile of the layer-1
    weight stream (raise it, e.g. 4096-8192, for the real 750k-feature model).
    """
    B = x_nchw.shape[0]
    x = x_nchw.reshape(B, -1).astype(jnp.float32)      # nn.Flatten(), row-major
    d_in = x.shape[1]
    hidden = w1.shape[1]
    out_f = w3.shape[1]

    # Lane/sublane-friendly padded sizes (all padding zeros => inert).
    b_pad = _round_up(max(B, 8), 8)                    # sublane alignment
    h_pad = _round_up(hidden, 128)                     # 500 -> 512
    o_pad = _round_up(max(out_f, 128), 128)            # 10  -> 128
    tk = int(min(tk, _round_up(d_in, 128)))
    k_pad = _round_up(d_in, tk)
    k_tiles = k_pad // tk

    # Layer-1 operands streamed in bf16; small layer-2/3 operands stay f32.
    x_p = jnp.zeros((b_pad, k_pad), jnp.bfloat16).at[:B, :d_in].set(
        x.astype(jnp.bfloat16))
    w1_p = jnp.zeros((k_pad, h_pad), jnp.bfloat16).at[:d_in, :hidden].set(
        w1.astype(jnp.bfloat16))
    b1_p = jnp.zeros((1, h_pad), jnp.float32).at[:, :hidden].set(b1.reshape(1, -1))
    w2_p = jnp.zeros((h_pad, h_pad), jnp.float32).at[:hidden, :hidden].set(w2)
    b2_p = jnp.zeros((1, h_pad), jnp.float32).at[:, :hidden].set(b2.reshape(1, -1))
    w3_p = jnp.zeros((h_pad, o_pad), jnp.float32).at[:hidden, :out_f].set(w3)
    b3_p = jnp.zeros((1, o_pad), jnp.float32).at[:, :out_f].set(b3.reshape(1, -1))

    grid_spec = pltpu.PrefetchScalarGridSpec(
        num_scalar_prefetch=0,
        grid=(k_tiles,),
        in_specs=[
            pl.BlockSpec((b_pad, tk), lambda k: (0, k)),      # x:  stream over K
            pl.BlockSpec((tk, h_pad), lambda k: (k, 0)),      # W1: stream over K
            pl.BlockSpec((1, h_pad), lambda k: (0, 0)),       # b1: resident
            pl.BlockSpec((h_pad, h_pad), lambda k: (0, 0)),   # W2: resident
            pl.BlockSpec((1, h_pad), lambda k: (0, 0)),       # b2: resident
            pl.BlockSpec((h_pad, o_pad), lambda k: (0, 0)),   # W3: resident
            pl.BlockSpec((1, o_pad), lambda k: (0, 0)),       # b3: resident
        ],
        out_specs=pl.BlockSpec((b_pad, o_pad), lambda k: (0, 0)),
        scratch_shapes=[pltpu.VMEM((b_pad, h_pad), jnp.float32)],  # layer-1 acc
    )

    out = pl.pallas_call(
        _mlp_kernel,
        out_shape=jax.ShapeDtypeStruct((b_pad, o_pad), jnp.float32),
        grid_spec=grid_spec,
        compiler_params=pltpu.CompilerParams(
            dimension_semantics=("arbitrary",),        # K is a reduction axis
            vmem_limit_bytes=48 * 1024 * 1024,         # safe on v5e/v6e/v7x
        ),
    )(x_p, w1_p, b1_p, w2_p, b2_p, w3_p, b3_p)

    return out[:B, :out_f]


def init_params(key, d_in, hidden, out_f):
    """PyTorch nn.Linear-style init (uniform +-1/sqrt(fan_in)).

    Weights are stored (in, out) for the kernel's x @ W convention; biases (1, out).
    """
    ks = jax.random.split(key, 6)

    def lin(kw, kb, fan_in, fan_out):
        bound = 1.0 / jnp.sqrt(fan_in)
        w = jax.random.uniform(kw, (fan_in, fan_out), jnp.float32, -bound, bound)
        b = jax.random.uniform(kb, (1, fan_out), jnp.float32, -bound, bound)
        return w, b

    w1, b1 = lin(ks[0], ks[1], d_in, hidden)
    w2, b2 = lin(ks[2], ks[3], hidden, hidden)
    w3, b3 = lin(ks[4], ks[5], hidden, out_f)
    return w1, b1, w2, b2, w3, b3


if __name__ == "__main__":
    key = jax.random.PRNGKey(0)
    k_x, k_p = jax.random.split(key)

    # Small shapes consistent with the module's forward: NCHW image -> flatten -> MLP.
    B, C, H, W = 2, 3, 16, 16
    D_IN = C * H * W          # 768 (the real module uses 500*500*3; same structure)
    HIDDEN = 500              # as in the module
    OUT_F = 10                # default `of=10`

    x = jax.random.normal(k_x, (B, C, H, W), jnp.float32)
    params = init_params(k_p, D_IN, HIDDEN, OUT_F)

    logits = neural_network_forward(x, *params, tk=512)   # 768 -> padded to 2 K-tiles
    jax.block_until_ready(logits)

    # Pure-JAX reference of the same forward pass (layer 1 uses the same bf16
    # rounding of x/W1 that the kernel streams; layers 2/3 are f32).
    w1, b1, w2, b2, w3, b3 = params
    xf = x.reshape(B, -1)
    xb = xf.astype(jnp.bfloat16).astype(jnp.float32)
    w1b = w1.astype(jnp.bfloat16).astype(jnp.float32)
    ref = jnp.maximum(xb @ w1b + b1, 0.0)
    ref = jnp.maximum(ref @ w2 + b2, 0.0)
    ref = ref @ w3 + b3

    assert logits.shape == (B, OUT_F)
    assert jnp.allclose(logits, ref, atol=2e-2, rtol=2e-2), (
        f"max abs err = {jnp.max(jnp.abs(logits - ref))}")

    print("KERNEL_OK")
</pallas_src>

<mosaic_0001>
module attributes {stable_mosaic.version = 11 : i64} {
  func.func @_mlp_kernel(%arg0: i32, %arg1: memref<8x512xbf16, #tpu.memory_space<vmem>>, %arg2: memref<512x512xbf16, #tpu.memory_space<vmem>>, %arg3: memref<1x512xf32, #tpu.memory_space<vmem>>, %arg4: memref<512x512xf32, #tpu.memory_space<vmem>>, %arg5: memref<1x512xf32, #tpu.memory_space<vmem>>, %arg6: memref<512x128xf32, #tpu.memory_space<vmem>>, %arg7: memref<1x128xf32, #tpu.memory_space<vmem>>, %arg8: memref<8x128xf32, #tpu.memory_space<vmem>>, %arg9: memref<8x512xf32, #tpu.memory_space<vmem>>) attributes {dimension_semantics = [#tpu.dimension_semantics<arbitrary>], iteration_bounds = array<i64: 2>, scalar_prefetch = 0 : i64, scratch_operands = 1 : i64, tpu.core_type = #tpu.core_type<tc>, window_params = [{transform_indices = @transform_0, window_bounds = array<i64: 8, 512>}, {transform_indices = @transform_1, window_bounds = array<i64: 512, 512>}, {pipeline_mode = #tpu.pipeline_mode<synchronous>, transform_indices = @transform_2, window_bounds = array<i64: 1, 512>}, {pipeline_mode = #tpu.pipeline_mode<synchronous>, transform_indices = @transform_3, window_bounds = array<i64: 512, 512>}, {pipeline_mode = #tpu.pipeline_mode<synchronous>, transform_indices = @transform_4, window_bounds = array<i64: 1, 512>}, {pipeline_mode = #tpu.pipeline_mode<synchronous>, transform_indices = @transform_5, window_bounds = array<i64: 512, 128>}, {pipeline_mode = #tpu.pipeline_mode<synchronous>, transform_indices = @transform_6, window_bounds = array<i64: 1, 128>}, {pipeline_mode = #tpu.pipeline_mode<synchronous>, transform_indices = @transform_7, window_bounds = array<i64: 8, 128>}]} {
    %c0_i32 = arith.constant 0 : i32
    %0 = arith.cmpi eq, %arg0, %c0_i32 : i32
    %1 = arith.extui %0 : i1 to i32
    %c0_i32_0 = arith.constant 0 : i32
    %2 = arith.cmpi ne, %1, %c0_i32_0 : i32
    scf.if %2 {
      %cst_9 = arith.constant 0.000000e+00 : f32
      %12 = vector.broadcast %cst_9 : f32 to vector<8x512xf32>
      %c0_10 = arith.constant 0 : index
      %c0_11 = arith.constant 0 : index
      %13 = vector.load %arg9[%c0_10, %c0_11] : memref<8x512xf32, #tpu.memory_space<vmem>>, vector<8x512xf32>
      tpu.vector_store %arg9[%c0_10, %c0_11], %12 {strides = array<i32>} : memref<8x512xf32, #tpu.memory_space<vmem>>, vector<8x512xf32>,
    } else {
    }
    %c0 = arith.constant 0 : index
    %c0_1 = arith.constant 0 : index
    %3 = vector.load %arg9[%c0, %c0_1] : memref<8x512xf32, #tpu.memory_space<vmem>>, vector<8x512xf32>
    %c0_2 = arith.constant 0 : index
    %c0_3 = arith.constant 0 : index
    %4 = vector.load %arg1[%c0_2, %c0_3] : memref<8x512xbf16, #tpu.memory_space<vmem>>, vector<8x512xbf16>
    %c0_4 = arith.constant 0 : index
    %c0_5 = arith.constant 0 : index
    %5 = vector.load %arg2[%c0_4, %c0_5] : memref<512x512xbf16, #tpu.memory_space<vmem>>, vector<512x512xbf16>
    %cst = arith.constant dense<0.000000e+00> : vector<8x512xf32>
    %6 = tpu.matmul %4, %5, %cst {dimension_numbers = #tpu.dot_dimension_numbers<[1], [0], [0], [1], [0, 0, 1, 1], [], []>} : vector<8x512xbf16>, vector<512x512xbf16>, vector<8x512xf32> -> vector<8x512xf32>
    %7 = arith.addf %3, %6 : vector<8x512xf32>
    %c0_6 = arith.constant 0 : index
    %c0_7 = arith.constant 0 : index
    %8 = vector.load %arg9[%c0_6, %c0_7] : memref<8x512xf32, #tpu.memory_space<vmem>>, vector<8x512xf32>
    tpu.vector_store %arg9[%c0_6, %c0_7], %7 {strides = array<i32>} : memref<8x512xf32, #tpu.memory_space<vmem>>, vector<8x512xf32>,
    %c1_i32 = arith.constant 1 : i32
    %9 = arith.cmpi eq, %arg0, %c1_i32 : i32
    %10 = arith.extui %9 : i1 to i32
    %c0_i32_8 = arith.constant 0 : i32
    %11 = arith.cmpi ne, %10, %c0_i32_8 : i32
    scf.if %11 {
      %c0_9 = arith.constant 0 : index
      %c0_10 = arith.constant 0 : index
      %12 = vector.load %arg9[%c0_9, %c0_10] : memref<8x512xf32, #tpu.memory_space<vmem>>, vector<8x512xf32>
      %c0_11 = arith.constant 0 : index
      %c0_12 = arith.constant 0 : index
      %13 = vector.load %arg3[%c0_11, %c0_12] : memref<1x512xf32, #tpu.memory_space<vmem>>, vector<1x512xf32>
      %14 = vector.broadcast %13 : vector<1x512xf32> to vector<8x512xf32>
      %15 = arith.addf %12, %14 : vector<8x512xf32>
      %cst_13 = arith.constant 0.000000e+00 : f32
      %16 = vector.broadcast %cst_13 : f32 to vector<8x512xf32>
      %17 = arith.maximumf %15, %16 : vector<8x512xf32>
      %c0_14 = arith.constant 0 : index
      %c0_15 = arith.constant 0 : index
      %18 = vector.load %arg4[%c0_14, %c0_15] : memref<512x512xf32, #tpu.memory_space<vmem>>, vector<512x512xf32>
      %cst_16 = arith.constant dense<0.000000e+00> : vector<8x512xf32>
      %19 = tpu.matmul %17, %18, %cst_16 {dimension_numbers = #tpu.dot_dimension_numbers<[1], [0], [0], [1], [0, 0, 1, 1], [], []>} : vector<8x512xf32>, vector<512x512xf32>, vector<8x512xf32> -> vector<8x512xf32>
      %c0_17 = arith.constant 0 : index
      %c0_18 = arith.constant 0 : index
      %20 = vector.load %arg5[%c0_17, %c0_18] : memref<1x512xf32, #tpu.memory_space<vmem>>, vector<1x512xf32>
      %21 = vector.broadcast %20 : vector<1x512xf32> to vector<8x512xf32>
      %22 = arith.addf %19, %21 : vector<8x512xf32>
      %cst_19 = arith.constant 0.000000e+00 : f32
      %23 = vector.broadcast %cst_19 : f32 to vector<8x512xf32>
      %24 = arith.maximumf %22, %23 : vector<8x512xf32>
      %c0_20 = arith.constant 0 : index
      %c0_21 = arith.constant 0 : index
      %25 = vector.load %arg6[%c0_20, %c0_21] : memref<512x128xf32, #tpu.memory_space<vmem>>, vector<512x128xf32>
      %cst_22 = arith.constant dense<0.000000e+00> : vector<8x128xf32>
      %26 = tpu.matmul %24, %25, %cst_22 {dimension_numbers = #tpu.dot_dimension_numbers<[1], [0], [0], [1], [0, 0, 1, 1], [], []>} : vector<8x512xf32>, vector<512x128xf32>, vector<8x128xf32> -> vector<8x128xf32>
      %c0_23 = arith.constant 0 : index
      %c0_24 = arith.constant 0 : index
      %27 = vector.load %arg7[%c0_23, %c0_24] : memref<1x128xf32, #tpu.memory_space<vmem>>, vector<1x128xf32>
      %28 = vector.broadcast %27 : vector<1x128xf32> to vector<8x128xf32>
      %29 = arith.addf %26, %28 : vector<8x128xf32>
      %c0_25 = arith.constant 0 : index
      %c0_26 = arith.constant 0 : index
      %30 = vector.load %arg8[%c0_25, %c0_26] : memref<8x128xf32, #tpu.memory_space<vmem>>, vector<8x128xf32>
      tpu.vector_store %arg8[%c0_25, %c0_26], %29 {strides = array<i32>} : memref<8x128xf32, #tpu.memory_space<vmem>>, vector<8x128xf32>,
    } else {
    }
    return
  }
  func.func @transform_0(%arg0: i32) -> (i32, i32) {
    %c0_i32 = arith.constant 0 : i32
    %c0_i32_0 = arith.constant 0 : i32
    return %c0_i32, %arg0 : i32, i32
  }
  func.func @transform_1(%arg0: i32) -> (i32, i32) {
    %c0_i32 = arith.constant 0 : i32
    %c0_i32_0 = arith.constant 0 : i32
    return %arg0, %c0_i32 : i32, i32
  }
  func.func @transform_2(%arg0: i32) -> (i32, i32) {
    %c0_i32 = arith.constant 0 : i32
    %c0_i32_0 = arith.constant 0 : i32
    %c0_i32_1 = arith.constant 0 : i32
    return %c0_i32, %c0_i32_0 : i32, i32
  }
  func.func @transform_3(%arg0: i32) -> (i32, i32) {
    %c0_i32 = arith.constant 0 : i32
    %c0_i32_0 = arith.constant 0 : i32
    %c0_i32_1 = arith.constant 0 : i32
    return %c0_i32, %c0_i32_0 : i32, i32
  }
  func.func @transform_4(%arg0: i32) -> (i32, i32) {
    %c0_i32 = arith.constant 0 : i32
    %c0_i32_0 = arith.constant 0 : i32
    %c0_i32_1 = arith.constant 0 : i32
    return %c0_i32, %c0_i32_0 : i32, i32
  }
  func.func @transform_5(%arg0: i32) -> (i32, i32) {
    %c0_i32 = arith.constant 0 : i32
    %c0_i32_0 = arith.constant 0 : i32
    %c0_i32_1 = arith.constant 0 : i32
    return %c0_i32, %c0_i32_0 : i32, i32
  }
  func.func @transform_6(%arg0: i32) -> (i32, i32) {
    %c0_i32 = arith.constant 0 : i32
    %c0_i32_0 = arith.constant 0 : i32
    %c0_i32_1 = arith.constant 0 : i32
    return %c0_i32, %c0_i32_0 : i32, i32
  }
  func.func @transform_7(%arg0: i32) -> (i32, i32) {
    %c0_i32 = arith.constant 0 : i32
    %c0_i32_0 = arith.constant 0 : i32
    %c0_i32_1 = arith.constant 0 : i32
    return %c0_i32, %c0_i32_0 : i32, i32
  }
}

</mosaic_0001>

<bundles_post_ra>
// kernel: neural_network_forward.1
= control target key start
LH: loop header
LB: loop body
LE: loop exit
PB: predicated region body
PF: predicated region fallthrough
CT: control target
= control target key end

     0   :  { %s2914_s24 = smov 0   ;;  %s4083_s0 = inlined_call_operand.vmem [shape: bf16[8,1024], index: 0, kind: input, shape index: {}]   ;;  %s4084_s1 = inlined_call_operand.vmem [shape: bf16[1024,512], index: 1, kind: input, shape index: {}]   ;;  %s4085_s2 = inlined_call_operand.vmem [shape: f32[1,512], index: 2, kind: input, shape index: {}]   ;;  %s4086_s3 = inlined_call_operand.vmem [shape: f32[512,512], index: 3, kind: input, shape index: {}]   ;;  %s4087_s4 = inlined_call_operand.vmem [shape: f32[1,512], index: 4, kind: input, shape index: {}]   ;;  %s4088_s5 = inlined_call_operand.vmem [shape: f32[512,128], index: 5, kind: input, shape index: {}]   ;;  %s4089_s6 = inlined_call_operand.vmem [shape: f32[1,128], index: 6, kind: input, shape index: {}]   ;;  %s4090_s7 = inlined_call_operand.vmem [shape: f32[8,128], index: 7, kind: output, shape index: {}]  }
   0x1 LB: > { %s2920_s25 = sadd.s32 4294967295, %s2871_s24   ;;  %p2118_p0 = scmp.ge.s32.totalorder %s2871_s24, 1  ;;  %s2871_s24 = sphi %s2914_s24, %s17_s24  }
   0x2   : > { %p245_p1 = scmp.lt.s32.totalorder %s2871_s24, 3 }
   0x4   : > { %p246_p2 = pnand %p2118_p0, %p245_p1 }
   0x5   : > { %s2119_s26 = sshll.u32 (!%p246_p2), %s2920_s25, 2  ;;  %s2121_s27 = sshll.u32 (!%p246_p2), %s2920_s25, 6 }
   0x6   : > { %249 = sbr.rel (%p246_p2) target bundleno = 920 (0x398), region = 48  ;;  %p279_p3 = scmp.lt.s32.totalorder (!%p246_p2), %s2119_s26, 7 }
   0x7   : > { %p285_p4 = scmp.lt.s32.totalorder (!%p246_p2), %s2121_s27, 127  ;;  %p2124_p5 = scmp.ne.s32.totalorder (!%p246_p2), %s2920_s25, 0 }
   0xd   : > { %s4092_s26 = smov (!%p279_p3, %s2119_s26), 7  ;;  %s4094_s27 = smov (!%p285_p4, %s2121_s27), 127 }
   0xe   : > { %s2120_s28 = sshll.u32 %s4092_s26, 2  ;;  %s2261_s9 = sshll.u32 %s4094_s27, 4  ;;  %v2873_v0 = vmov (!%p2124_p5), 0.0  }
   0xf   : > { %s2929_s8 = scalar_lea.vmem %s4083_s0, %s2120_s28  ;;  %s2934_s12 = scalar_lea.vmem %s4084_s1, %s2261_s9  ;;  %295 = vst [vmem:[#allocation2] sm:$0xff] (!%p2124_p5), %v2873_v0  ;;  %296 = vst [vmem:[#allocation2 + $0x8] sm:$0xff] (!%p2124_p5), %v2873_v0 }
  0x10   : > { %294 = sbr.rel (%p2124_p5) target bundleno = 23 (0x17), region = 52  ;;  %297 = vst [vmem:[#allocation2 + $0x10] sm:$0xff] (!%p2124_p5), %v2873_v0  ;;  %298 = vst [vmem:[#allocation2 + $0x18] sm:$0xff] (!%p2124_p5), %v2873_v0 }
  0x17 PF: > { %v2669_v1 = vld [vmem:[%s2934_s12 + $0x4] ss:$16 sps:$4 sm:$0xff]   ;;  %v2673_v3 = vld [vmem:[%s2934_s12] ss:$16 sps:$4 sm:$0xff]   ;;  %v304_v49 = vld [vmem:[%s2929_s8 + $0x8] sm:$0xff]  ;;  %p2257_p6 = scmp.ne.s32.totalorder %s2920_s25, 1 }
  0x18   : > { %v2671_v2 = vld [vmem:[%s2934_s12 + $0x204] ss:$16 sps:$4 sm:$0xff]   ;;  %1087 = vmatprep.subr.bf16.mxu0 %v2669_v1  ;;  %v2674_v4 = vld [vmem:[%s2934_s12 + $0x200] ss:$16 sps:$4 sm:$0xff]   ;;  %v2128_v52 = vcombine.high %v304_v49, %v304_v49 }
  0x19   : > { %1128 = vmatprep.subr.bf16.mxu1 %v2671_v2  ;;  %v2675_v5 = vld [vmem:[%s2934_s12 + $0x24] ss:$16 sps:$4 sm:$0xff]   ;;  %1088 = vmatpush1.bf16.msra.mxu0 %v2673_v3  ;;  %v2679_v7 = vld [vmem:[%s2934_s12 + $0x20] ss:$16 sps:$4 sm:$0xff]  }
  0x1a   : > { %1129 = vmatpush1.bf16.msra.mxu1 %v2674_v4  ;;  %v2677_v6 = vld [vmem:[%s2934_s12 + $0x224] ss:$16 sps:$4 sm:$0xff]   ;;  %1089 = vmatprep.subr.bf16.mxu0 %v2675_v5  ;;  %v2680_v8 = vld [vmem:[%s2934_s12 + $0x220] ss:$16 sps:$4 sm:$0xff]   ;;  %v2771_v5 = vld [vmem:[%s2934_s12 + $0xc] ss:$16 sps:$4 sm:$0xff]  }
  0x1b   : > { %1130 = vmatprep.subr.bf16.mxu1 %v2677_v6  ;;  %v2681_v9 = vld [vmem:[%s2934_s12 + $0x44] ss:$16 sps:$4 sm:$0xff]   ;;  %v2685_v11 = vld [vmem:[%s2934_s12 + $0x40] ss:$16 sps:$4 sm:$0xff]   ;;  %1160 = vmatprep.mubr.bf16.mxu1 %v2128_v52  ;;  %v2774_v6 = vld [vmem:[%s2934_s12 + $0x20c] ss:$16 sps:$4 sm:$0xff]  }
  0x1c   : > { %v2683_v10 = vld [vmem:[%s2934_s12 + $0x244] ss:$16 sps:$4 sm:$0xff]   ;;  %v2686_v12 = vld [vmem:[%s2934_s12 + $0x240] ss:$16 sps:$4 sm:$0xff]  }
  0x1d   : > { %1090 = vmatpush1.bf16.msra.mxu0 %v2679_v7  ;;  %v2687_v13 = vld [vmem:[%s2934_s12 + $0x64] ss:$16 sps:$4 sm:$0xff]   ;;  %v2691_v15 = vld [vmem:[%s2934_s12 + $0x60] ss:$16 sps:$4 sm:$0xff]  }
  0x1e   : > { %1131 = vmatpush1.bf16.msra.mxu1 %v2680_v8  ;;  %1091 = vmatprep.subr.bf16.mxu0 %v2681_v9  ;;  %v2689_v14 = vld [vmem:[%s2934_s12 + $0x264] ss:$16 sps:$4 sm:$0xff]   ;;  %v2692_v16 = vld [vmem:[%s2934_s12 + $0x260] ss:$16 sps:$4 sm:$0xff]   ;;  %v3010_v8 = vcombine.low %v304_v49, %v304_v49  ;;  %v2769_v9 = vld [vmem:[%s2934_s12 + $0x8] ss:$16 sps:$4 sm:$0xff]  }
  0x1f   : > { %1132 = vmatprep.subr.bf16.mxu1 %v2683_v10  ;;  %v2693_v17 = vld [vmem:[%s2934_s12 + $0x84] ss:$16 sps:$4 sm:$0xff]   ;;  %v2697_v19 = vld [vmem:[%s2934_s12 + $0x80] ss:$16 sps:$4 sm:$0xff]   ;;  %v2772_v10 = vld [vmem:[%s2934_s12 + $0x208] ss:$16 sps:$4 sm:$0xff]  }
  0x20   : > { %v2695_v18 = vld [vmem:[%s2934_s12 + $0x284] ss:$16 sps:$4 sm:$0xff]   ;;  %v2698_v20 = vld [vmem:[%s2934_s12 + $0x280] ss:$16 sps:$4 sm:$0xff]   ;;  %v2829_v49 = vld [vmem:[%s2934_s12 + $0x148] ss:$16 sps:$4 sm:$0xff]  }
  0x21   : > { %1092 = vmatpush1.bf16.msra.mxu0 %v2685_v11  ;;  %v2699_v21 = vld [vmem:[%s2934_s12 + $0xa4] ss:$16 sps:$4 sm:$0xff]   ;;  %v2703_v23 = vld [vmem:[%s2934_s12 + $0xa0] ss:$16 sps:$4 sm:$0xff]   ;;  %v2777_v11 = vld [vmem:[%s2934_s12 + $0x2c] ss:$16 sps:$4 sm:$0xff]  }
  0x22   : > { %1133 = vmatpush1.bf16.msra.mxu1 %v2686_v12  ;;  %1093 = vmatprep.subr.bf16.mxu0 %v2687_v13  ;;  %v2701_v22 = vld [vmem:[%s2934_s12 + $0x2a4] ss:$16 sps:$4 sm:$0xff]   ;;  %v2704_v24 = vld [vmem:[%s2934_s12 + $0x2a0] ss:$16 sps:$4 sm:$0xff]   ;;  %v2780_v12 = vld [vmem:[%s2934_s12 + $0x22c] ss:$16 sps:$4 sm:$0xff]  }
  0x23   : > { %1134 = vmatprep.subr.bf16.mxu1 %v2689_v14  ;;  %v2705_v25 = vld [vmem:[%s2934_s12 + $0xc4] ss:$16 sps:$4 sm:$0xff]   ;;  %v2709_v27 = vld [vmem:[%s2934_s12 + $0xc0] ss:$16 sps:$4 sm:$0xff]   ;;  %v2775_v13 = vld [vmem:[%s2934_s12 + $0x28] ss:$16 sps:$4 sm:$0xff]  }
  0x24   : > { %v2707_v26 = vld [vmem:[%s2934_s12 + $0x2c4] ss:$16 sps:$4 sm:$0xff]   ;;  %v2710_v28 = vld [vmem:[%s2934_s12 + $0x2c0] ss:$16 sps:$4 sm:$0xff]   ;;  %v2778_v14 = vld [vmem:[%s2934_s12 + $0x228] ss:$16 sps:$4 sm:$0xff]  }
  0x25   : > { %1094 = vmatpush1.bf16.msra.mxu0 %v2691_v15  ;;  %v2711_v29 = vld [vmem:[%s2934_s12 + $0xe4] ss:$16 sps:$4 sm:$0xff]   ;;  %v2715_v31 = vld [vmem:[%s2934_s12 + $0xe0] ss:$16 sps:$4 sm:$0xff]   ;;  %v2783_v15 = vld [vmem:[%s2934_s12 + $0x4c] ss:$16 sps:$4 sm:$0xff]  }
  0x26   : > { %1135 = vmatpush1.bf16.msra.mxu1 %v2692_v16  ;;  %1095 = vmatprep.subr.bf16.mxu0 %v2693_v17  ;;  %v2713_v30 = vld [vmem:[%s2934_s12 + $0x2e4] ss:$16 sps:$4 sm:$0xff]   ;;  %v2716_v32 = vld [vmem:[%s2934_s12 + $0x2e0] ss:$16 sps:$4 sm:$0xff]   ;;  %v2786_v16 = vld [vmem:[%s2934_s12 + $0x24c] ss:$16 sps:$4 sm:$0xff]  }
  0x27   : > { %1136 = vmatprep.subr.bf16.mxu1 %v2695_v18  ;;  %v2717_v33 = vld [vmem:[%s2934_s12 + $0x104] ss:$16 sps:$4 sm:$0xff]   ;;  %v2721_v35 = vld [vmem:[%s2934_s12 + $0x100] ss:$16 sps:$4 sm:$0xff]   ;;  %v2781_v17 = vld [vmem:[%s2934_s12 + $0x48] ss:$16 sps:$4 sm:$0xff]  }
  0x28   : > { %v2719_v34 = vld [vmem:[%s2934_s12 + $0x304] ss:$16 sps:$4 sm:$0xff]   ;;  %v2722_v36 = vld [vmem:[%s2934_s12 + $0x300] ss:$16 sps:$4 sm:$0xff]   ;;  %v2784_v18 = vld [vmem:[%s2934_s12 + $0x248] ss:$16 sps:$4 sm:$0xff]  }
  0x29   : > { %1096 = vmatpush1.bf16.msra.mxu0 %v2697_v19  ;;  %v2723_v37 = vld [vmem:[%s2934_s12 + $0x124] ss:$16 sps:$4 sm:$0xff]   ;;  %v2727_v39 = vld [vmem:[%s2934_s12 + $0x120] ss:$16 sps:$4 sm:$0xff]   ;;  %v2789_v19 = vld [vmem:[%s2934_s12 + $0x6c] ss:$16 sps:$4 sm:$0xff]  }
  0x2a   : > { %1137 = vmatpush1.bf16.msra.mxu1 %v2698_v20  ;;  %1097 = vmatprep.subr.bf16.mxu0 %v2699_v21  ;;  %v2725_v38 = vld [vmem:[%s2934_s12 + $0x324] ss:$16 sps:$4 sm:$0xff]   ;;  %v2728_v40 = vld [vmem:[%s2934_s12 + $0x320] ss:$16 sps:$4 sm:$0xff]   ;;  %v2792_v20 = vld [vmem:[%s2934_s12 + $0x26c] ss:$16 sps:$4 sm:$0xff]  }
  0x2b   : > { %1138 = vmatprep.subr.bf16.mxu1 %v2701_v22  ;;  %v2729_v41 = vld [vmem:[%s2934_s12 + $0x144] ss:$16 sps:$4 sm:$0xff]   ;;  %v2733_v43 = vld [vmem:[%s2934_s12 + $0x140] ss:$16 sps:$4 sm:$0xff]   ;;  %v2787_v21 = vld [vmem:[%s2934_s12 + $0x68] ss:$16 sps:$4 sm:$0xff]  }
  0x2c   : > { %v2731_v42 = vld [vmem:[%s2934_s12 + $0x344] ss:$16 sps:$4 sm:$0xff]   ;;  %v2734_v44 = vld [vmem:[%s2934_s12 + $0x340] ss:$16 sps:$4 sm:$0xff]   ;;  %v2790_v22 = vld [vmem:[%s2934_s12 + $0x268] ss:$16 sps:$4 sm:$0xff]  }
  0x2d   : > { %1098 = vmatpush1.bf16.msra.mxu0 %v2703_v23  ;;  %v2735_v45 = vld [vmem:[%s2934_s12 + $0x164] ss:$16 sps:$4 sm:$0xff]   ;;  %v2739_v50 = vld [vmem:[%s2934_s12 + $0x160] ss:$16 sps:$4 sm:$0xff]   ;;  %v2795_v23 = vld [vmem:[%s2934_s12 + $0x8c] ss:$16 sps:$4 sm:$0xff]  }
  0x2e   : > { %1139 = vmatpush1.bf16.msra.mxu1 %v2704_v24  ;;  %1099 = vmatprep.subr.bf16.mxu0 %v2705_v25  ;;  %v2737_v46 = vld [vmem:[%s2934_s12 + $0x364] ss:$16 sps:$4 sm:$0xff]   ;;  %v2740_v51 = vld [vmem:[%s2934_s12 + $0x360] ss:$16 sps:$4 sm:$0xff]   ;;  %v2798_v24 = vld [vmem:[%s2934_s12 + $0x28c] ss:$16 sps:$4 sm:$0xff]  }
  0x2f   : > { %1140 = vmatprep.subr.bf16.mxu1 %v2707_v26  ;;  %v303_v47 = vld [vmem:[%s2929_s8] sm:$0xff]  ;;  %v2793_v25 = vld [vmem:[%s2934_s12 + $0x88] ss:$16 sps:$4 sm:$0xff]  }
  0x30   : > { %v2984_v48 = vcombine.high %v303_v47, %v303_v47  ;;  %v2741_v53 = vld [vmem:[%s2934_s12 + $0x184] ss:$16 sps:$4 sm:$0xff]   ;;  %v2745_v55 = vld [vmem:[%s2934_s12 + $0x180] ss:$16 sps:$4 sm:$0xff]   ;;  %v3008_v7 = vcombine.low %v303_v47, %v303_v47  ;;  %v2796_v26 = vld [vmem:[%s2934_s12 + $0x288] ss:$16 sps:$4 sm:$0xff]  }
  0x31   : > { %1100 = vmatpush1.bf16.msra.mxu0 %v2709_v27  ;;  %v2743_v54 = vld [vmem:[%s2934_s12 + $0x384] ss:$16 sps:$4 sm:$0xff]   ;;  %v2746_v56 = vld [vmem:[%s2934_s12 + $0x380] ss:$16 sps:$4 sm:$0xff]   ;;  %v2801_v27 = vld [vmem:[%s2934_s12 + $0xac] ss:$16 sps:$4 sm:$0xff]  }
  0x32   : > { %1141 = vmatpush1.bf16.msra.mxu1 %v2710_v28  ;;  %1101 = vmatprep.subr.bf16.mxu0 %v2711_v29  ;;  %v2747_v57 = vld [vmem:[%s2934_s12 + $0x1a4] ss:$16 sps:$4 sm:$0xff]   ;;  %v2751_v59 = vld [vmem:[%s2934_s12 + $0x1a0] ss:$16 sps:$4 sm:$0xff]   ;;  %v2804_v28 = vld [vmem:[%s2934_s12 + $0x2ac] ss:$16 sps:$4 sm:$0xff]  }
  0x33   : > { %1142 = vmatprep.subr.bf16.mxu1 %v2713_v30  ;;  %1119 = vmatprep.mubr.bf16.mxu0 %v2984_v48  ;;  %v2749_v58 = vld [vmem:[%s2934_s12 + $0x3a4] ss:$16 sps:$4 sm:$0xff]   ;;  %v2752_v60 = vld [vmem:[%s2934_s12 + $0x3a0] ss:$16 sps:$4 sm:$0xff]   ;;  %v2799_v29 = vld [vmem:[%s2934_s12 + $0xa8] ss:$16 sps:$4 sm:$0xff]  }
  0x34   : > { %v2753_v61 = vld [vmem:[%s2934_s12 + $0x1c4] ss:$16 sps:$4 sm:$0xff]   ;;  %v2757_v63 = vld [vmem:[%s2934_s12 + $0x1c0] ss:$16 sps:$4 sm:$0xff]   ;;  %v2802_v30 = vld [vmem:[%s2934_s12 + $0x2a8] ss:$16 sps:$4 sm:$0xff]  }
  0x35   : > { %1102 = vmatpush1.bf16.msra.mxu0 %v2715_v31  ;;  %v2755_v62 = vld [vmem:[%s2934_s12 + $0x3c4] ss:$16 sps:$4 sm:$0xff]   ;;  %v2758_v0 = vld [vmem:[%s2934_s12 + $0x3c0] ss:$16 sps:$4 sm:$0xff]   ;;  %v2807_v31 = vld [vmem:[%s2934_s12 + $0xcc] ss:$16 sps:$4 sm:$0xff]  }
  0x36   : > { %1143 = vmatpush1.bf16.msra.mxu1 %v2716_v32  ;;  %1103 = vmatprep.subr.bf16.mxu0 %v2717_v33  ;;  %v2759_v1 = vld [vmem:[%s2934_s12 + $0x1e4] ss:$16 sps:$4 sm:$0xff]   ;;  %v2763_v3 = vld [vmem:[%s2934_s12 + $0x1e0] ss:$16 sps:$4 sm:$0xff]   ;;  %v2810_v32 = vld [vmem:[%s2934_s12 + $0x2cc] ss:$16 sps:$4 sm:$0xff]  }
  0x37   : > { %1144 = vmatprep.subr.bf16.mxu1 %v2719_v34  ;;  %v2761_v2 = vld [vmem:[%s2934_s12 + $0x3e4] ss:$16 sps:$4 sm:$0xff]   ;;  %v2764_v4 = vld [vmem:[%s2934_s12 + $0x3e0] ss:$16 sps:$4 sm:$0xff]   ;;  %v2805_v33 = vld [vmem:[%s2934_s12 + $0xc8] ss:$16 sps:$4 sm:$0xff]  }
  0x38   : > { %v2808_v34 = vld [vmem:[%s2934_s12 + $0x2c8] ss:$16 sps:$4 sm:$0xff]   ;;  %v2831_v47 = vld [vmem:[%s2934_s12 + $0x14c] ss:$16 sps:$4 sm:$0xff]  }
  0x39   : > { %1104 = vmatpush1.bf16.msra.mxu0 %v2721_v35  ;;  %v2813_v35 = vld [vmem:[%s2934_s12 + $0xec] ss:$16 sps:$4 sm:$0xff]  }
  0x3a   : > { %1145 = vmatpush1.bf16.msra.mxu1 %v2722_v36  ;;  %1105 = vmatprep.subr.bf16.mxu0 %v2723_v37  ;;  %v2816_v36 = vld [vmem:[%s2934_s12 + $0x2ec] ss:$16 sps:$4 sm:$0xff]   ;;  %v2811_v37 = vld [vmem:[%s2934_s12 + $0xe8] ss:$16 sps:$4 sm:$0xff]  }
  0x3b   : > { %1146 = vmatprep.subr.bf16.mxu1 %v2725_v38  ;;  %v2814_v38 = vld [vmem:[%s2934_s12 + $0x2e8] ss:$16 sps:$4 sm:$0xff]  }
  0x3d   : > { %1106 = vmatpush1.bf16.msra.mxu0 %v2727_v39  ;;  %v2819_v39 = vld [vmem:[%s2934_s12 + $0x10c] ss:$16 sps:$4 sm:$0xff]  }
  0x3e   : > { %1147 = vmatpush1.bf16.msra.mxu1 %v2728_v40  ;;  %1107 = vmatprep.subr.bf16.mxu0 %v2729_v41  ;;  %v2822_v40 = vld [vmem:[%s2934_s12 + $0x30c] ss:$16 sps:$4 sm:$0xff]   ;;  %v2817_v41 = vld [vmem:[%s2934_s12 + $0x108] ss:$16 sps:$4 sm:$0xff]  }
  0x3f   : > { %1148 = vmatprep.subr.bf16.mxu1 %v2731_v42  ;;  %v2820_v42 = vld [vmem:[%s2934_s12 + $0x308] ss:$16 sps:$4 sm:$0xff]  }
  0x41   : > { %1108 = vmatpush1.bf16.msra.mxu0 %v2733_v43  ;;  %v2825_v43 = vld [vmem:[%s2934_s12 + $0x12c] ss:$16 sps:$4 sm:$0xff]  }
  0x42   : > { %1149 = vmatpush1.bf16.msra.mxu1 %v2734_v44  ;;  %1109 = vmatprep.subr.bf16.mxu0 %v2735_v45  ;;  %v2828_v44 = vld [vmem:[%s2934_s12 + $0x32c] ss:$16 sps:$4 sm:$0xff]   ;;  %v2823_v45 = vld [vmem:[%s2934_s12 + $0x128] ss:$16 sps:$4 sm:$0xff]  }
  0x43   : > { %1150 = vmatprep.subr.bf16.mxu1 %v2737_v46  ;;  %v2826_v46 = vld [vmem:[%s2934_s12 + $0x328] ss:$16 sps:$4 sm:$0xff]  }
  0x45   : > { %1110 = vmatpush1.bf16.msra.mxu0 %v2739_v50  ;;  %v2832_v50 = vld [vmem:[%s2934_s12 + $0x348] ss:$16 sps:$4 sm:$0xff]  }
  0x46   : > { %1151 = vmatpush1.bf16.msra.mxu1 %v2740_v51  ;;  %1111 = vmatprep.subr.bf16.mxu0 %v2741_v53  ;;  %v2837_v51 = vld [vmem:[%s2934_s12 + $0x16c] ss:$16 sps:$4 sm:$0xff]   ;;  %v2835_v53 = vld [vmem:[%s2934_s12 + $0x168] ss:$16 sps:$4 sm:$0xff]  }
  0x47   : > { %1152 = vmatprep.subr.bf16.mxu1 %v2743_v54  ;;  %v2838_v54 = vld [vmem:[%s2934_s12 + $0x368] ss:$16 sps:$4 sm:$0xff]  }
  0x49   : > { %1112 = vmatpush1.bf16.msra.mxu0 %v2745_v55  ;;  %v2843_v55 = vld [vmem:[%s2934_s12 + $0x18c] ss:$16 sps:$4 sm:$0xff]  }
  0x4a   : > { %1153 = vmatpush1.bf16.msra.mxu1 %v2746_v56  ;;  %1113 = vmatprep.subr.bf16.mxu0 %v2747_v57  ;;  %v2846_v56 = vld [vmem:[%s2934_s12 + $0x38c] ss:$16 sps:$4 sm:$0xff]   ;;  %v2841_v57 = vld [vmem:[%s2934_s12 + $0x188] ss:$16 sps:$4 sm:$0xff]  }
  0x4b   : > { %1154 = vmatprep.subr.bf16.mxu1 %v2749_v58  ;;  %v2844_v58 = vld [vmem:[%s2934_s12 + $0x388] ss:$16 sps:$4 sm:$0xff]  }
  0x4d   : > { %1114 = vmatpush1.bf16.msra.mxu0 %v2751_v59  ;;  %v2849_v59 = vld [vmem:[%s2934_s12 + $0x1ac] ss:$16 sps:$4 sm:$0xff]  }
  0x4e   : > { %1155 = vmatpush1.bf16.msra.mxu1 %v2752_v60  ;;  %1115 = vmatprep.subr.bf16.mxu0 %v2753_v61  ;;  %v2852_v60 = vld [vmem:[%s2934_s12 + $0x3ac] ss:$16 sps:$4 sm:$0xff]   ;;  %v2847_v61 = vld [vmem:[%s2934_s12 + $0x1a8] ss:$16 sps:$4 sm:$0xff]  }
  0x4f   : > { %1156 = vmatprep.subr.bf16.mxu1 %v2755_v62  ;;  %v2850_v62 = vld [vmem:[%s2934_s12 + $0x3a8] ss:$16 sps:$4 sm:$0xff]  }
  0x51   : > { %1116 = vmatpush1.bf16.msra.mxu0 %v2757_v63  ;;  %v2855_v63 = vld [vmem:[%s2934_s12 + $0x1cc] ss:$16 sps:$4 sm:$0xff]  }
  0x52   : > { %1157 = vmatpush1.bf16.msra.mxu1 %v2758_v0  ;;  %1117 = vmatprep.subr.bf16.mxu0 %v2759_v1  ;;  %v2858_v0 = vld [vmem:[%s2934_s12 + $0x3cc] ss:$16 sps:$4 sm:$0xff]   ;;  %v2853_v1 = vld [vmem:[%s2934_s12 + $0x1c8] ss:$16 sps:$4 sm:$0xff]  }
  0x53   : > { %1158 = vmatprep.subr.bf16.mxu1 %v2761_v2  ;;  %v2856_v2 = vld [vmem:[%s2934_s12 + $0x3c8] ss:$16 sps:$4 sm:$0xff]  }
  0x55   : > { %1118 = vmatpush1.bf16.msra.mxu0 %v2763_v3  ;;  %v2861_v3 = vld [vmem:[%s2934_s12 + $0x1ec] ss:$16 sps:$4 sm:$0xff]  }
  0x56   : > { %1159 = vmatpush1.bf16.msra.mxu1 %v2764_v4  ;;  %1169 = vmatprep.subr.bf16.mxu0 %v2771_v5  ;;  %v2864_v4 = vld [vmem:[%s2934_s12 + $0x3ec] ss:$16 sps:$4 sm:$0xff]   ;;  %v2859_v5 = vld [vmem:[%s2934_s12 + $0x1e8] ss:$16 sps:$4 sm:$0xff]  }
  0x57   : > { %1210 = vmatprep.subr.bf16.mxu1 %v2774_v6  ;;  %v2862_v6 = vld [vmem:[%s2934_s12 + $0x3e8] ss:$16 sps:$4 sm:$0xff]  }
  0x58   : > { %1120 = vmatmul.mubr.bf16.vlgmr.msra.gmra.mrb[0].mxu0 %v3008_v7 }
  0x59   : > { %1161 = vmatmul.mubr.bf16.vlgmr.msra.gmra.mrb[0].mxu1 %v3010_v8  ;;  %1170 = vmatpush1.bf16.msra.mxu0 %v2769_v9 }
  0x5a   : > { %1211 = vmatpush1.bf16.msra.mxu1 %v2772_v10  ;;  %1171 = vmatprep.subr.bf16.mxu0 %v2777_v11  ;;  %v299_v10 = vld [vmem:[#allocation2] sm:$0xff] }
  0x5b   : > { %1212 = vmatprep.subr.bf16.mxu1 %v2780_v12  ;;  %1201 = vmatprep.mubr.bf16.mxu0 %v2984_v48  ;;  %v2834_v48 = vld [vmem:[%s2934_s12 + $0x34c] ss:$16 sps:$4 sm:$0xff]  }
  0x5c   : > { %1242 = vmatprep.mubr.bf16.mxu1 %v2128_v52  ;;  %v2840_v52 = vld [vmem:[%s2934_s12 + $0x36c] ss:$16 sps:$4 sm:$0xff]  }
  0x5d   : > { %1172 = vmatpush1.bf16.msra.mxu0 %v2775_v13 }
  0x5e   : > { %1213 = vmatpush1.bf16.msra.mxu1 %v2778_v14  ;;  %1173 = vmatprep.subr.bf16.mxu0 %v2783_v15  ;;  %v300_v14 = vld [vmem:[#allocation2 + $0x8] sm:$0xff] }
  0x5f   : > { %1214 = vmatprep.subr.bf16.mxu1 %v2786_v16 }
  0x61   : > { %1174 = vmatpush1.bf16.msra.mxu0 %v2781_v17 }
  0x62   : > { %1215 = vmatpush1.bf16.msra.mxu1 %v2784_v18  ;;  %1175 = vmatprep.subr.bf16.mxu0 %v2789_v19 }
  0x63   : > { %1216 = vmatprep.subr.bf16.mxu1 %v2792_v20 }
  0x65   : > { %1176 = vmatpush1.bf16.msra.mxu0 %v2787_v21 }
  0x66   : > { %1217 = vmatpush1.bf16.msra.mxu1 %v2790_v22  ;;  %1177 = vmatprep.subr.bf16.mxu0 %v2795_v23 }
  0x67   : > { %1218 = vmatprep.subr.bf16.mxu1 %v2798_v24 }
  0x69   : > { %1178 = vmatpush1.bf16.msra.mxu0 %v2793_v25 }
  0x6a   : > { %1219 = vmatpush1.bf16.msra.mxu1 %v2796_v26  ;;  %1179 = vmatprep.subr.bf16.mxu0 %v2801_v27  ;;  %v302_v26 = vld [vmem:[#allocation2 + $0x18] sm:$0xff] }
  0x6b   : > { %1220 = vmatprep.subr.bf16.mxu1 %v2804_v28 }
  0x6d   : > { %1180 = vmatpush1.bf16.msra.mxu0 %v2799_v29 }
  0x6e   : > { %1221 = vmatpush1.bf16.msra.mxu1 %v2802_v30  ;;  %1181 = vmatprep.subr.bf16.mxu0 %v2807_v31 }
  0x6f   : > { %1222 = vmatprep.subr.bf16.mxu1 %v2810_v32 }
  0x71   : > { %1182 = vmatpush1.bf16.msra.mxu0 %v2805_v33 }
  0x72   : > { %1223 = vmatpush1.bf16.msra.mxu1 %v2808_v34  ;;  %1183 = vmatprep.subr.bf16.mxu0 %v2813_v35  ;;  %v1298_v35 = vld [vmem:[%s4086_s3 + $0x8] sm:$0xff] (!%p2257_p6) }
  0x73   : > { %1224 = vmatprep.subr.bf16.mxu1 %v2816_v36  ;;  %v1302_v36 = vld [vmem:[%s4086_s3 + $0x28] sm:$0xff] (!%p2257_p6) }
  0x75   : > { %1184 = vmatpush1.bf16.msra.mxu0 %v2811_v37  ;;  %v1300_v37 = vld [vmem:[%s4086_s3 + $0x18] sm:$0xff] (!%p2257_p6) }
  0x76   : > { %1225 = vmatpush1.bf16.msra.mxu1 %v2814_v38  ;;  %1185 = vmatprep.subr.bf16.mxu0 %v2819_v39  ;;  %v2332_v38 = vpack.c.bf16 (!%p2257_p6), %v1302_v36, %v1298_v35  ;;  %v1304_v39 = vld [vmem:[%s4086_s3 + $0x38] sm:$0xff] (!%p2257_p6)  ;;  %v1337_v36 = vld [vmem:[%s4086_s3 + $0x140] sm:$0xff] (!%p2257_p6) }
  0x77   : > { %1226 = vmatprep.subr.bf16.mxu1 %v2822_v40  ;;  %v1297_v40 = vld [vmem:[%s4086_s3] sm:$0xff] (!%p2257_p6) }
  0x79   : > { %1186 = vmatpush1.bf16.msra.mxu0 %v2817_v41  ;;  %v1301_v41 = vld [vmem:[%s4086_s3 + $0x20] sm:$0xff] (!%p2257_p6) }
  0x7a   : > { %1227 = vmatpush1.bf16.msra.mxu1 %v2820_v42  ;;  %1187 = vmatprep.subr.bf16.mxu0 %v2825_v43  ;;  %v2460_v42 = vpack.c.bf16 (!%p2257_p6), %v1304_v39, %v1300_v37  ;;  %v2334_v43 = vpack.c.bf16 (!%p2257_p6), %v1301_v41, %v1297_v40  ;;  %v1341_v37 = vld [vmem:[%s4086_s3 + $0x160] sm:$0xff] (!%p2257_p6)  ;;  %v1343_v40 = vld [vmem:[%s4086_s3 + $0x170] sm:$0xff] (!%p2257_p6)  ;;  %v1346_v41 = vld [vmem:[%s4086_s3 + $0x188] sm:$0xff] (!%p2257_p6) }
  0x7b   : > { %1228 = vmatprep.subr.bf16.mxu1 %v2828_v44  ;;  %v1299_v44 = vld [vmem:[%s4086_s3 + $0x10] sm:$0xff] (!%p2257_p6) }
  0x7d   : > { %1188 = vmatpush1.bf16.msra.mxu0 %v2823_v45  ;;  %v1303_v45 = vld [vmem:[%s4086_s3 + $0x30] sm:$0xff] (!%p2257_p6) }
  0x7e   : > { %1229 = vmatpush1.bf16.msra.mxu1 %v2826_v46  ;;  %1189 = vmatprep.subr.bf16.mxu0 %v2831_v47  ;;  %v1306_v46 = vld [vmem:[%s4086_s3 + $0x48] sm:$0xff] (!%p2257_p6)  ;;  %v2462_v47 = vpack.c.bf16 (!%p2257_p6), %v1303_v45, %v1299_v44  ;;  %v1352_v44 = vld [vmem:[%s4086_s3 + $0x1b8] sm:$0xff] (!%p2257_p6)  ;;  %v2354_v45 = vpack.c.bf16 (!%p2257_p6), %v1341_v37, %v1337_v36  ;;  %v1379_v36 = vld [vmem:[%s4086_s3 + $0x290] sm:$0xff] (!%p2257_p6) }
  0x7f   : > { %1230 = vmatprep.subr.bf16.mxu1 %v2834_v48  ;;  %v1310_v48 = vld [vmem:[%s4086_s3 + $0x68] sm:$0xff] (!%p2257_p6) }
  0x81   : > { %1190 = vmatpush1.bf16.msra.mxu0 %v2829_v49  ;;  %v1308_v49 = vld [vmem:[%s4086_s3 + $0x58] sm:$0xff] (!%p2257_p6) }
  0x82   : > { %1231 = vmatpush1.bf16.msra.mxu1 %v2832_v50  ;;  %1191 = vmatprep.subr.bf16.mxu0 %v2837_v51  ;;  %v1312_v50 = vld [vmem:[%s4086_s3 + $0x78] sm:$0xff] (!%p2257_p6)  ;;  %v2336_v51 = vpack.c.bf16 (!%p2257_p6), %v1310_v48, %v1306_v46  ;;  %v1345_v48 = vld [vmem:[%s4086_s3 + $0x180] sm:$0xff] (!%p2257_p6) }
  0x83   : > { %1232 = vmatprep.subr.bf16.mxu1 %v2840_v52  ;;  %v2464_v52 = vpack.c.bf16 (!%p2257_p6), %v1312_v50, %v1308_v49  ;;  %v1349_v49 = vld [vmem:[%s4086_s3 + $0x1a0] sm:$0xff] (!%p2257_p6)  ;;  %v1347_v50 = vld [vmem:[%s4086_s3 + $0x190] sm:$0xff] (!%p2257_p6) }
  0x85   : > { %1192 = vmatpush1.bf16.msra.mxu0 %v2835_v53  ;;  %v1305_v53 = vld [vmem:[%s4086_s3 + $0x40] sm:$0xff] (!%p2257_p6) }
  0x86   : > { %1233 = vmatpush1.bf16.msra.mxu1 %v2838_v54  ;;  %1193 = vmatprep.subr.bf16.mxu0 %v2843_v55  ;;  %v1309_v54 = vld [vmem:[%s4086_s3 + $0x60] sm:$0xff] (!%p2257_p6)  ;;  %v1307_v55 = vld [vmem:[%s4086_s3 + $0x50] sm:$0xff] (!%p2257_p6) }
  0x87   : > { %1234 = vmatprep.subr.bf16.mxu1 %v2846_v56  ;;  %v2338_v56 = vpack.c.bf16 (!%p2257_p6), %v1309_v54, %v1305_v53  ;;  %v1354_v53 = vld [vmem:[%s4086_s3 + $0x1c8] sm:$0xff] (!%p2257_p6) }
  0x88   : > { %v1358_v54 = vld [vmem:[%s4086_s3 + $0x1e8] sm:$0xff] (!%p2257_p6) }
  0x89   : > { %1194 = vmatpush1.bf16.msra.mxu0 %v2841_v57  ;;  %v1311_v57 = vld [vmem:[%s4086_s3 + $0x70] sm:$0xff] (!%p2257_p6) }
  0x8a   : > { %1235 = vmatpush1.bf16.msra.mxu1 %v2844_v58  ;;  %1195 = vmatprep.subr.bf16.mxu0 %v2849_v59  ;;  %v1314_v58 = vld [vmem:[%s4086_s3 + $0x88] sm:$0xff] (!%p2257_p6) }
  0x8b   : > { %1236 = vmatprep.subr.bf16.mxu1 %v2852_v60  ;;  %v1318_v59 = vld [vmem:[%s4086_s3 + $0xa8] sm:$0xff] (!%p2257_p6)  ;;  %v2466_v60 = vpack.c.bf16 (!%p2257_p6), %v1311_v57, %v1307_v55  ;;  %v1356_v55 = vld [vmem:[%s4086_s3 + $0x1d8] sm:$0xff] (!%p2257_p6)  ;;  %v2358_v57 = vpack.c.bf16 (!%p2257_p6), %v1349_v49, %v1345_v48  ;;  %v1389_v48 = vld [vmem:[%s4086_s3 + $0x2e0] sm:$0xff] (!%p2257_p6) }
  0x8c   : > { %v1387_v49 = vld [vmem:[%s4086_s3 + $0x2d0] sm:$0xff] (!%p2257_p6) }
  0x8d   : > { %1196 = vmatpush1.bf16.msra.mxu0 %v2847_v61  ;;  %v2340_v61 = vpack.c.bf16 (!%p2257_p6), %v1318_v59, %v1314_v58  ;;  %v2360_v59 = vpack.c.bf16 (!%p2257_p6), %v1358_v54, %v1354_v53  ;;  %v1398_v53 = vld [vmem:[%s4086_s3 + $0x328] sm:$0xff] (!%p2257_p6)  ;;  %v1396_v54 = vld [vmem:[%s4086_s3 + $0x318] sm:$0xff] (!%p2257_p6) }
  0x8e   : > { %1237 = vmatpush1.bf16.msra.mxu1 %v2850_v62  ;;  %1197 = vmatprep.subr.bf16.mxu0 %v2855_v63  ;;  %v1316_v62 = vld [vmem:[%s4086_s3 + $0x98] sm:$0xff] (!%p2257_p6) }
  0x8f   : > { %1238 = vmatprep.subr.bf16.mxu1 %v2858_v0  ;;  %v1320_v63 = vld [vmem:[%s4086_s3 + $0xb8] sm:$0xff] (!%p2257_p6)  ;;  %v1313_v0 = vld [vmem:[%s4086_s3 + $0x80] sm:$0xff] (!%p2257_p6) }
  0x91   : > { %1198 = vmatpush1.bf16.msra.mxu0 %v2853_v1  ;;  %v2468_v1 = vpack.c.bf16 (!%p2257_p6), %v1320_v63, %v1316_v62  ;;  %v1355_v62 = vld [vmem:[%s4086_s3 + $0x1d0] sm:$0xff] (!%p2257_p6) }
  0x92   : > { %1239 = vmatpush1.bf16.msra.mxu1 %v2856_v2  ;;  %1199 = vmatprep.subr.bf16.mxu0 %v2861_v3  ;;  %v1317_v2 = vld [vmem:[%s4086_s3 + $0xa0] sm:$0xff] (!%p2257_p6)  ;;  %v1315_v3 = vld [vmem:[%s4086_s3 + $0x90] sm:$0xff] (!%p2257_p6) }
  0x93   : > { %1240 = vmatprep.subr.bf16.mxu1 %v2864_v4  ;;  %v1319_v4 = vld [vmem:[%s4086_s3 + $0xb0] sm:$0xff] (!%p2257_p6) }
  0x95   : > { %1200 = vmatpush1.bf16.msra.mxu0 %v2859_v5  ;;  %v2342_v5 = vpack.c.bf16 (!%p2257_p6), %v1317_v2, %v1313_v0  ;;  %v1359_v0 = vld [vmem:[%s4086_s3 + $0x1f0] sm:$0xff] (!%p2257_p6)  ;;  %v1366_v2 = vld [vmem:[%s4086_s3 + $0x228] sm:$0xff] (!%p2257_p6) }
  0x96   : > { %1241 = vmatpush1.bf16.msra.mxu1 %v2862_v6  ;;  %2333 = vmatprep.subr.bf16.mxu0 (!%p2257_p6), %v2332_v38  ;;  %v1322_v6 = vld [vmem:[%s4086_s3 + $0xc8] sm:$0xff] (!%p2257_p6)  ;;  %v1339_v38 = vld [vmem:[%s4086_s3 + $0x150] sm:$0xff] (!%p2257_p6) }
  0x97   : > { %2461 = vmatprep.subr.bf16.mxu1 (!%p2257_p6), %v2460_v42  ;;  %v1350_v42 = vld [vmem:[%s4086_s3 + $0x1a8] sm:$0xff] (!%p2257_p6)  ;;  %v2482_v46 = vpack.c.bf16 (!%p2257_p6), %v1343_v40, %v1339_v38  ;;  %v1383_v38 = vld [vmem:[%s4086_s3 + $0x2b0] sm:$0xff] (!%p2257_p6) }
  0x98   : > { %1202 = vmatmul.mubr.bf16.vlgmr.msra.gmra.mrb[4].mxu0 %v3008_v7  ;;  %v301_v7 = vld [vmem:[#allocation2 + $0x10] sm:$0xff]  ;;  %v1390_v40 = vld [vmem:[%s4086_s3 + $0x2e8] sm:$0xff] (!%p2257_p6) }
  0x99   : > { %1243 = vmatmul.mubr.bf16.vlgmr.msra.gmra.mrb[4].mxu1 %v3010_v8  ;;  %2335 = vmatpush1.bf16.msra.mxu0 (!%p2257_p6), %v2334_v43  ;;  %v1348_v43 = vld [vmem:[%s4086_s3 + $0x198] sm:$0xff] (!%p2257_p6) }
  0x9a   : > { %2463 = vmatpush1.bf16.msra.mxu1 (!%p2257_p6), %v2462_v47  ;;  %2337 = vmatprep.subr.bf16.mxu0 (!%p2257_p6), %v2336_v51  ;;  %v2356_v47 = vpack.c.bf16 (!%p2257_p6), %v1350_v42, %v1346_v41  ;;  %v2484_v51 = vpack.c.bf16 (!%p2257_p6), %v1352_v44, %v1348_v43  ;;  %v1388_v41 = vld [vmem:[%s4086_s3 + $0x2d8] sm:$0xff] (!%p2257_p6)  ;;  %v1385_v44 = vld [vmem:[%s4086_s3 + $0x2c0] sm:$0xff] (!%p2257_p6) }
  0x9b   : > { %2465 = vmatprep.subr.bf16.mxu1 (!%p2257_p6), %v2464_v52  ;;  %v1351_v52 = vld [vmem:[%s4086_s3 + $0x1b0] sm:$0xff] (!%p2257_p6)  ;;  %v1392_v42 = vld [vmem:[%s4086_s3 + $0x2f8] sm:$0xff] (!%p2257_p6) }
  0x9c   : > { %v2486_v58 = vpack.c.bf16 (!%p2257_p6), %v1351_v52, %v1347_v50  ;;  %v1391_v50 = vld [vmem:[%s4086_s3 + $0x2f0] sm:$0xff] (!%p2257_p6)  ;;  %v1394_v52 = vld [vmem:[%s4086_s3 + $0x308] sm:$0xff] (!%p2257_p6) }
  0x9d   : > { %2339 = vmatpush1.bf16.msra.mxu0 (!%p2257_p6), %v2338_v56  ;;  %v1360_v56 = vld [vmem:[%s4086_s3 + $0x1f8] sm:$0xff] (!%p2257_p6) }
  0x9e   : > { %2467 = vmatpush1.bf16.msra.mxu1 (!%p2257_p6), %v2466_v60  ;;  %2341 = vmatprep.subr.bf16.mxu0 (!%p2257_p6), %v2340_v61  ;;  %v1353_v60 = vld [vmem:[%s4086_s3 + $0x1c0] sm:$0xff] (!%p2257_p6)  ;;  %v2488_v63 = vpack.c.bf16 (!%p2257_p6), %v1360_v56, %v1356_v55  ;;  %v1400_v55 = vld [vmem:[%s4086_s3 + $0x338] sm:$0xff] (!%p2257_p6) }
  0x9f   : > { %2469 = vmatprep.subr.bf16.mxu1 (!%p2257_p6), %v2468_v1  ;;  %v1357_v61 = vld [vmem:[%s4086_s3 + $0x1e0] sm:$0xff] (!%p2257_p6)  ;;  %v1362_v1 = vld [vmem:[%s4086_s3 + $0x208] sm:$0xff] (!%p2257_p6) }
  0xa1   : > { %2343 = vmatpush1.bf16.msra.mxu0 (!%p2257_p6), %v2342_v5  ;;  %v2362_v5 = vpack.c.bf16 (!%p2257_p6), %v1357_v61, %v1353_v60  ;;  %v2506_v60 = vpack.c.bf16 (!%p2257_p6), %v1391_v50, %v1387_v49  ;;  %v2380_v61 = vpack.c.bf16 (!%p2257_p6), %v1398_v53, %v1394_v52  ;;  %v1432_v49 = vld [vmem:[%s4086_s3 + $0x438] sm:$0xff] (!%p2257_p6) }
 0x12b   : > { %v1121_v9 = vpop.f32.mrb[0].mxu0 }
 0x12c   : > { %v1162_v11 = vpop.f32.mrb[0].mxu1  ;;  %v1123_v13 = vpop.f32.mrb[1].mxu0 }
 0x12d   : > { %v1163_v12 = vadd.f32 %v1162_v11, %v1121_v9  ;;  %v1164_v15 = vpop.f32.mrb[1].mxu1  ;;  %v1125_v17 = vpop.f32.mrb[2].mxu0  ;;  %v1326_v9 = vld [vmem:[%s4086_s3 + $0xe8] sm:$0xff] (!%p2257_p6)  ;;  %v2470_v11 = vpack.c.bf16 (!%p2257_p6), %v1319_v4, %v1315_v3  ;;  %v1364_v3 = vld [vmem:[%s4086_s3 + $0x218] sm:$0xff] (!%p2257_p6) }
 0x12e   : > { %v1165_v16 = vadd.f32 %v1164_v15, %v1123_v13  ;;  %v1166_v18 = vpop.f32.mrb[2].mxu1  ;;  %v1126_v20 = vpop.f32.mrb[3].mxu0  ;;  %v1328_v13 = vld [vmem:[%s4086_s3 + $0xf8] sm:$0xff] (!%p2257_p6)  ;;  %v1325_v15 = vld [vmem:[%s4086_s3 + $0xe0] sm:$0xff] (!%p2257_p6)  ;;  %v1323_v17 = vld [vmem:[%s4086_s3 + $0xd0] sm:$0xff] (!%p2257_p6) }
 0x12f   : > { %v1251_v19 = vadd.f32 %v1163_v12, %v299_v10  ;;  %v1167_v21 = vpop.f32.mrb[3].mxu1  ;;  %v1324_v10 = vld [vmem:[%s4086_s3 + $0xd8] sm:$0xff] (!%p2257_p6)  ;;  %v2344_v12 = vpack.c.bf16 (!%p2257_p6), %v1326_v9, %v1322_v6  ;;  %v1327_v18 = vld [vmem:[%s4086_s3 + $0xf0] sm:$0xff] (!%p2257_p6)  ;;  %v1334_v20 = vld [vmem:[%s4086_s3 + $0x128] sm:$0xff] (!%p2257_p6)  ;;  %2471 = vmatpush1.bf16.msra.mxu1 (!%p2257_p6), %v2470_v11  ;;  %v2490_v6 = vpack.c.bf16 (!%p2257_p6), %v1359_v0, %v1355_v62  ;;  %v2364_v9 = vpack.c.bf16 (!%p2257_p6), %v1366_v2, %v1362_v1 }
 0x130   : > { %v1252_v22 = vadd.f32 %v1165_v16, %v300_v14  ;;  %v1321_v14 = vld [vmem:[%s4086_s3 + $0xc0] sm:$0xff] (!%p2257_p6)  ;;  %v2472_v16 = vpack.c.bf16 (!%p2257_p6), %v1328_v13, %v1324_v10  ;;  %v1332_v21 = vld [vmem:[%s4086_s3 + $0x118] sm:$0xff] (!%p2257_p6)  ;;  %v1395_v0 = vld [vmem:[%s4086_s3 + $0x310] sm:$0xff] (!%p2257_p6)  ;;  %v2508_v1 = vpack.c.bf16 (!%p2257_p6), %v1400_v55, %v1396_v54 }
 0x131   : > { %1255 = vst [vmem:[#allocation2] sm:$0xff] %v1251_v19  ;;  %v1330_v19 = vld [vmem:[%s4086_s3 + $0x108] sm:$0xff] (!%p2257_p6)  ;;  %2345 = vmatprep.subr.bf16.mxu0 (!%p2257_p6), %v2344_v12  ;;  %v1368_v4 = vld [vmem:[%s4086_s3 + $0x238] sm:$0xff] (!%p2257_p6)  ;;  %v1361_v10 = vld [vmem:[%s4086_s3 + $0x200] sm:$0xff] (!%p2257_p6) }
 0x132   : > { %1256 = vst [vmem:[#allocation2 + $0x8] sm:$0xff] %v1252_v22  ;;  %v1336_v22 = vld [vmem:[%s4086_s3 + $0x138] sm:$0xff] (!%p2257_p6)  ;;  %2473 = vmatprep.subr.bf16.mxu1 (!%p2257_p6), %v2472_v16  ;;  %v1365_v11 = vld [vmem:[%s4086_s3 + $0x220] sm:$0xff] (!%p2257_p6)  ;;  %v1363_v12 = vld [vmem:[%s4086_s3 + $0x210] sm:$0xff] (!%p2257_p6)  ;;  %v2492_v13 = vpack.c.bf16 (!%p2257_p6), %v1368_v4, %v1364_v3 }
 0x133   : > { %v1374_v16 = vld [vmem:[%s4086_s3 + $0x268] sm:$0xff] (!%p2257_p6)  ;;  %v1393_v62 = vld [vmem:[%s4086_s3 + $0x300] sm:$0xff] (!%p2257_p6)  ;;  %v1399_v2 = vld [vmem:[%s4086_s3 + $0x330] sm:$0xff] (!%p2257_p6) }
 0x134   : > { %v1402_v3 = vld [vmem:[%s4086_s3 + $0x348] sm:$0xff] (!%p2257_p6)  ;;  %v1425_v54 = vld [vmem:[%s4086_s3 + $0x400] sm:$0xff] (!%p2257_p6) }
 0x135   : > { %v1406_v4 = vld [vmem:[%s4086_s3 + $0x368] sm:$0xff] (!%p2257_p6)  ;;  %v1429_v55 = vld [vmem:[%s4086_s3 + $0x420] sm:$0xff] (!%p2257_p6) }
 0x139   : > { %v1264_v56 = vld [vmem:[#allocation2 + $0x8] sm:$0xff] (!%p2257_p6) }
 0x16b   : > { %v1203_v23 = vpop.f32.mrb[4].mxu0 }
 0x16c   : > { %v1244_v24 = vpop.f32.mrb[4].mxu1  ;;  %v1205_v25 = vpop.f32.mrb[5].mxu0  ;;  %1262 = sbr.rel (%p2257_p6) target bundleno = 920 (0x398), region = 56 }
 0x16d   : > { %v1245_v8 = vadd.f32 %v1244_v24, %v1203_v23  ;;  %v1246_v27 = vpop.f32.mrb[5].mxu1  ;;  %v1207_v29 = vpop.f32.mrb[6].mxu0  ;;  %v2346_v23 = vpack.c.bf16 (!%p2257_p6), %v1325_v15, %v1321_v14  ;;  %v2348_v24 = vpack.c.bf16 (!%p2257_p6), %v1334_v20, %v1330_v19  ;;  %v1367_v14 = vld [vmem:[%s4086_s3 + $0x230] sm:$0xff] (!%p2257_p6)  ;;  %v1370_v15 = vld [vmem:[%s4086_s3 + $0x248] sm:$0xff] (!%p2257_p6)  ;;  %v2366_v19 = vpack.c.bf16 (!%p2257_p6), %v1365_v11, %v1361_v10 }
 0x16e   : > { %v1247_v28 = vadd.f32 %v1246_v27, %v1205_v25  ;;  %v1248_v30 = vpop.f32.mrb[6].mxu1  ;;  %v1208_v32 = vpop.f32.mrb[7].mxu0  ;;  %v1333_v25 = vld [vmem:[%s4086_s3 + $0x120] sm:$0xff] (!%p2257_p6)  ;;  %v2476_v27 = vpack.c.bf16 (!%p2257_p6), %v1336_v22, %v1332_v21  ;;  %v1338_v29 = vld [vmem:[%s4086_s3 + $0x148] sm:$0xff] (!%p2257_p6)  ;;  %v1269_v20 = vlaneseq (!%p2257_p6)  ;;  %v2494_v21 = vpack.c.bf16 (!%p2257_p6), %v1367_v14, %v1363_v12 }
 0x16f   : > { %v1253_v31 = vadd.f32 %v1245_v8, %v301_v7  ;;  %v1249_v33 = vpop.f32.mrb[7].mxu1  ;;  %v2474_v7 = vpack.c.bf16 (!%p2257_p6), %v1327_v18, %v1323_v17  ;;  %v1329_v8 = vld [vmem:[%s4086_s3 + $0x100] sm:$0xff] (!%p2257_p6)  ;;  %v1342_v30 = vld [vmem:[%s4086_s3 + $0x168] sm:$0xff] (!%p2257_p6)  ;;  %v1344_v32 = vld [vmem:[%s4086_s3 + $0x178] sm:$0xff] (!%p2257_p6)  ;;  %2347 = vmatpush1.bf16.msra.mxu0 (!%p2257_p6), %v2346_v23  ;;  %v2368_v22 = vpack.c.bf16 (!%p2257_p6), %v1374_v16, %v1370_v15  ;;  %v2510_v12 = vpack.c.bf16 (!%p2257_p6), %v1399_v2, %v1395_v0 }
 0x170   : > { %v1254_v34 = vadd.f32 %v1247_v28, %v302_v26  ;;  %v1331_v26 = vld [vmem:[%s4086_s3 + $0x110] sm:$0xff] (!%p2257_p6)  ;;  %v2350_v33 = vpack.c.bf16 (!%p2257_p6), %v1333_v25, %v1329_v8  ;;  %2349 = vmatprep.subr.bf16.mxu0 (!%p2257_p6), %v2348_v24  ;;  %v2352_v35 = vpack.c.bf16 (!%p2257_p6), %v1342_v30, %v1338_v29  ;;  %v1372_v17 = vld [vmem:[%s4086_s3 + $0x258] sm:$0xff] (!%p2257_p6)  ;;  %v1369_v23 = vld [vmem:[%s4086_s3 + $0x240] sm:$0xff] (!%p2257_p6) }
 0x171   : > { %1257 = vst [vmem:[#allocation2 + $0x10] sm:$0xff] %v1253_v31  ;;  %v1335_v28 = vld [vmem:[%s4086_s3 + $0x130] sm:$0xff] (!%p2257_p6)  ;;  %v1340_v31 = vld [vmem:[%s4086_s3 + $0x158] sm:$0xff] (!%p2257_p6)  ;;  %2475 = vmatpush1.bf16.msra.mxu1 (!%p2257_p6), %v2474_v7  ;;  %v1373_v7 = vld [vmem:[%s4086_s3 + $0x260] sm:$0xff] (!%p2257_p6) }
 0x172   : > { %1258 = vst [vmem:[#allocation2 + $0x18] sm:$0xff] %v1254_v34  ;;  %v2478_v34 = vpack.c.bf16 (!%p2257_p6), %v1335_v28, %v1331_v26  ;;  %2477 = vmatprep.subr.bf16.mxu1 (!%p2257_p6), %v2476_v27  ;;  %v2480_v39 = vpack.c.bf16 (!%p2257_p6), %v1344_v32, %v1340_v31  ;;  %v1376_v18 = vld [vmem:[%s4086_s3 + $0x278] sm:$0xff] (!%p2257_p6)  ;;  %v1371_v24 = vld [vmem:[%s4086_s3 + $0x250] sm:$0xff] (!%p2257_p6)  ;;  %v1378_v26 = vld [vmem:[%s4086_s3 + $0x288] sm:$0xff] (!%p2257_p6)  ;;  %v2370_v30 = vpack.c.bf16 (!%p2257_p6), %v1373_v7, %v1369_v23  ;;  %v3332_v31 = vshrl.u32 (!%p2257_p6), %v1269_v20, 7 }
 0x173   : > { %2351 = vmatpush1.bf16.msra.mxu0 %v2350_v33  ;;  %v2496_v8 = vpack.c.bf16 %v1376_v18, %v1372_v17  ;;  %v1375_v25 = vld [vmem:[%s4086_s3 + $0x270] sm:$0xff]  ;;  %v1382_v27 = vld [vmem:[%s4086_s3 + $0x2a8] sm:$0xff]  ;;  %v1380_v28 = vld [vmem:[%s4086_s3 + $0x298] sm:$0xff] }
 0x174   : > { %2353 = vmatprep.subr.bf16.mxu0 %v2352_v35  ;;  %v1384_v29 = vld [vmem:[%s4086_s3 + $0x2b8] sm:$0xff]  ;;  %v2498_v32 = vpack.c.bf16 %v1375_v25, %v1371_v24  ;;  %v2372_v33 = vpack.c.bf16 %v1382_v27, %v1378_v26  ;;  %v1381_v35 = vld [vmem:[%s4086_s3 + $0x2a0] sm:$0xff]  ;;  %v1403_v16 = vld [vmem:[%s4086_s3 + $0x350] sm:$0xff]  ;;  %v1271_v23 = vsub.s32 0, %v3332_v31 }
 0x175   : > { %2479 = vmatpush1.bf16.msra.mxu1 %v2478_v34  ;;  %v1377_v34 = vld [vmem:[%s4086_s3 + $0x280] sm:$0xff]  ;;  %v2500_v37 = vpack.c.bf16 %v1384_v29, %v1380_v28  ;;  %v1407_v18 = vld [vmem:[%s4086_s3 + $0x370] sm:$0xff]  ;;  %v1414_v20 = vld [vmem:[%s4086_s3 + $0x3a8] sm:$0xff] }
 0x176   : > { %2481 = vmatprep.subr.bf16.mxu1 %v2480_v39  ;;  %v1386_v39 = vld [vmem:[%s4086_s3 + $0x2c8] sm:$0xff]  ;;  %v2374_v43 = vpack.c.bf16 %v1381_v35, %v1377_v34  ;;  %v1401_v14 = vld [vmem:[%s4086_s3 + $0x340] sm:$0xff]  ;;  %v2514_v24 = vpack.c.bf16 %v1407_v18, %v1403_v16  ;;  %v1411_v27 = vld [vmem:[%s4086_s3 + $0x390] sm:$0xff] }
 0x177   : > { %2355 = vmatpush1.bf16.msra.mxu0 %v2354_v45  ;;  %v1275_v45 = vsub.s32 1, %v3332_v31  ;;  %v1405_v15 = vld [vmem:[%s4086_s3 + $0x360] sm:$0xff]  ;;  %v1415_v29 = vld [vmem:[%s4086_s3 + $0x3b0] sm:$0xff]  ;;  %v1424_v34 = vld [vmem:[%s4086_s3 + $0x3f8] sm:$0xff] }
 0x178   : > { %2357 = vmatprep.subr.bf16.mxu0 %v2356_v47  ;;  %v2376_v47 = vpack.c.bf16 %v1390_v40, %v1386_v39  ;;  %v2386_v7 = vpack.c.bf16 %v1405_v15, %v1401_v14  ;;  %v1409_v25 = vld [vmem:[%s4086_s3 + $0x380] sm:$0xff]  ;;  %v1440_v0 = vld [vmem:[%s4086_s3 + $0x478] sm:$0xff] }
 0x179   : > { %2483 = vmatpush1.bf16.msra.mxu1 %v2482_v46  ;;  %v2502_v46 = vpack.c.bf16 %v1383_v38, %v1379_v36  ;;  %v1413_v26 = vld [vmem:[%s4086_s3 + $0x3a0] sm:$0xff]  ;;  %v2518_v38 = vpack.c.bf16 %v1415_v29, %v1411_v27  ;;  %v1448_v14 = vld [vmem:[%s4086_s3 + $0x4b8] sm:$0xff] }
 0x17a   : > { %2485 = vmatprep.subr.bf16.mxu1 %v2484_v51  ;;  %v2504_v51 = vpack.c.bf16 %v1392_v42, %v1388_v41  ;;  %v2390_v36 = vpack.c.bf16 %v1413_v26, %v1409_v25  ;;  %v1417_v40 = vld [vmem:[%s4086_s3 + $0x3c0] sm:$0xff]  ;;  %v1419_v42 = vld [vmem:[%s4086_s3 + $0x3d0] sm:$0xff]  ;;  %v1456_v25 = vld [vmem:[%s4086_s3 + $0x4f8] sm:$0xff] }
 0x17b   : > { %2359 = vmatpush1.bf16.msra.mxu0 %v2358_v57  ;;  %v3386_v57 = vld [vmem:[%s4085_s2] sm:$0xf] }
 0x17c   : > { %2361 = vmatprep.subr.bf16.mxu0 %v2360_v59  ;;  %v1276_v59 = vrot.slane %v3386_v57, %v1275_v45  ;;  %v1272_v35 = vrot.slane %v3386_v57, %v1271_v23  ;;  %v1421_v41 = vld [vmem:[%s4086_s3 + $0x3e0] sm:$0xff] }
 0x17d   : > { %2487 = vmatpush1.bf16.msra.mxu1 %v2486_v58  ;;  %v2378_v58 = vpack.c.bf16 %v1389_v48, %v1385_v44  ;;  %v1423_v44 = vld [vmem:[%s4086_s3 + $0x3f0] sm:$0xff]  ;;  %v1428_v48 = vld [vmem:[%s4086_s3 + $0x418] sm:$0xff]  ;;  %v1441_v18 = vld [vmem:[%s4086_s3 + $0x480] sm:$0xff] }
 0x17e   : > { %2489 = vmatprep.subr.bf16.mxu1 %v2488_v63  ;;  %v1397_v63 = vld [vmem:[%s4086_s3 + $0x320] sm:$0xff]  ;;  %v2522_v52 = vpack.c.bf16 %v1423_v44, %v1419_v42  ;;  %v1459_v44 = vld [vmem:[%s4086_s3 + $0x510] sm:$0xff] }
 0x17f   : > { %2363 = vmatpush1.bf16.msra.mxu0 %v2362_v5  ;;  %v1290_v5 = vadd.f32 %v1276_v59, %v1264_v56  ;;  %v2382_v10 = vpack.c.bf16 %v1397_v63, %v1393_v62  ;;  %v1427_v56 = vld [vmem:[%s4086_s3 + $0x410] sm:$0xff]  ;;  %v1436_v63 = vld [vmem:[%s4086_s3 + $0x458] sm:$0xff]  ;;  %v1449_v29 = vld [vmem:[%s4086_s3 + $0x4c0] sm:$0xff] }
 0x180   : > { %2365 = vmatprep.subr.bf16.mxu0 %v2364_v9  ;;  %v1408_v9 = vld [vmem:[%s4086_s3 + $0x378] sm:$0xff]  ;;  %v1431_v59 = vld [vmem:[%s4086_s3 + $0x430] sm:$0xff]  ;;  %v1457_v42 = vld [vmem:[%s4086_s3 + $0x500] sm:$0xff] }
 0x181   : > { %2491 = vmatpush1.bf16.msra.mxu1 %v2490_v6  ;;  %v1404_v6 = vld [vmem:[%s4086_s3 + $0x358] sm:$0xff]  ;;  %v1294_v11 = vmax.f32 %v1290_v5, 0.0  ;;  %v2526_v2 = vpack.c.bf16 %v1431_v59, %v1427_v56  ;;  %v1437_v5 = vld [vmem:[%s4086_s3 + $0x460] sm:$0xff]  ;;  %v1467_v59 = vld [vmem:[%s4086_s3 + $0x550] sm:$0xff] }
 0x182   : > { %2493 = vmatprep.subr.bf16.mxu1 %v2492_v13  ;;  %v2384_v13 = vpack.c.bf16 %v1406_v4, %v1402_v3  ;;  %v2512_v17 = vpack.c.bf16 %v1408_v9, %v1404_v6  ;;  %v1433_v4 = vld [vmem:[%s4086_s3 + $0x440] sm:$0xff]  ;;  %v1435_v6 = vld [vmem:[%s4086_s3 + $0x450] sm:$0xff]  ;;  %v2528_v9 = vpack.c.bf16 %v1440_v0, %v1436_v63  ;;  %v1478_v63 = vld [vmem:[%s4086_s3 + $0x5a8] sm:$0xff] }
 0x183   : > { %2367 = vmatpush1.bf16.msra.mxu0 %v2366_v19  ;;  %v1410_v19 = vld [vmem:[%s4086_s3 + $0x388] sm:$0xff]  ;;  %1639 = vmatprep.mubr.f32.mxu0 %v1294_v11  ;;  %v2402_v15 = vpack.c.bf16 %v1437_v5, %v1433_v4  ;;  %v1465_v56 = vld [vmem:[%s4086_s3 + $0x540] sm:$0xff]  ;;  %v1476_v0 = vld [vmem:[%s4086_s3 + $0x598] sm:$0xff] }
 0x184   : > { %2369 = vmatprep.subr.bf16.mxu0 %v2368_v22  ;;  %v1416_v22 = vld [vmem:[%s4086_s3 + $0x3b8] sm:$0xff]  ;;  %1781 = vmatprep.mubr.f32.mxu1 %v1294_v11  ;;  %v1442_v11 = vld [vmem:[%s4086_s3 + $0x488] sm:$0xff]  ;;  %v1473_v4 = vld [vmem:[%s4086_s3 + $0x580] sm:$0xff] }
 0x185   : > { %2495 = vmatpush1.bf16.msra.mxu1 %v2494_v21  ;;  %v1412_v21 = vld [vmem:[%s4086_s3 + $0x398] sm:$0xff] }
 0x186   : > { %2497 = vmatprep.subr.bf16.mxu1 %v2496_v8  ;;  %v2388_v8 = vpack.c.bf16 %v1414_v20, %v1410_v19  ;;  %v2516_v28 = vpack.c.bf16 %v1416_v22, %v1412_v21  ;;  %v1445_v19 = vld [vmem:[%s4086_s3 + $0x4a0] sm:$0xff]  ;;  %v1443_v20 = vld [vmem:[%s4086_s3 + $0x490] sm:$0xff] }
 0x187   : > { %2371 = vmatpush1.bf16.msra.mxu0 %v2370_v30  ;;  %v1418_v30 = vld [vmem:[%s4086_s3 + $0x3c8] sm:$0xff]  ;;  %v1447_v22 = vld [vmem:[%s4086_s3 + $0x4b0] sm:$0xff]  ;;  %v2406_v26 = vpack.c.bf16 %v1445_v19, %v1441_v18 }
 0x188   : > { %2373 = vmatprep.subr.bf16.mxu0 %v2372_v33  ;;  %v1420_v33 = vld [vmem:[%s4086_s3 + $0x3d8] sm:$0xff]  ;;  %v2534_v27 = vpack.c.bf16 %v1447_v22, %v1443_v20  ;;  %v1481_v22 = vld [vmem:[%s4086_s3 + $0x5c0] sm:$0xff] }
 0x189   : > { %2499 = vmatpush1.bf16.msra.mxu1 %v2498_v32  ;;  %v1422_v32 = vld [vmem:[%s4086_s3 + $0x3e8] sm:$0xff] }
 0x18a   : > { %2501 = vmatprep.subr.bf16.mxu1 %v2500_v37  ;;  %v1263_v37 = vld [vmem:[#allocation2] sm:$0xff]  ;;  %v2392_v39 = vpack.c.bf16 %v1422_v32, %v1418_v30  ;;  %v1451_v32 = vld [vmem:[%s4086_s3 + $0x4d0] sm:$0xff] }
 0x18b   : > { %2375 = vmatpush1.bf16.msra.mxu0 %v2374_v43  ;;  %v2520_v43 = vpack.c.bf16 %v1424_v34, %v1420_v33  ;;  %v1289_v50 = vadd.f32 %v1272_v35, %v1263_v37  ;;  %v1453_v30 = vld [vmem:[%s4086_s3 + $0x4e0] sm:$0xff]  ;;  %v1455_v34 = vld [vmem:[%s4086_s3 + $0x4f0] sm:$0xff]  ;;  %v1458_v35 = vld [vmem:[%s4086_s3 + $0x508] sm:$0xff] }
 0x18c   : > { %2377 = vmatprep.subr.bf16.mxu0 %v2376_v47  ;;  %v1430_v47 = vld [vmem:[%s4086_s3 + $0x428] sm:$0xff]  ;;  %v1460_v37 = vld [vmem:[%s4086_s3 + $0x518] sm:$0xff] }
 0x18d   : > { %2503 = vmatpush1.bf16.msra.mxu1 %v2502_v46  ;;  %v1426_v46 = vld [vmem:[%s4086_s3 + $0x408] sm:$0xff]  ;;  %v1293_v62 = vmax.f32 %v1289_v50, 0.0  ;;  %v1468_v50 = vld [vmem:[%s4086_s3 + $0x558] sm:$0xff] }
 0x18e   : > { %2505 = vmatprep.subr.bf16.mxu1 %v2504_v51  ;;  %v2394_v51 = vpack.c.bf16 %v1421_v41, %v1417_v40  ;;  %v2396_v53 = vpack.c.bf16 %v1430_v47, %v1426_v46  ;;  %v2538_v40 = vpack.c.bf16 %v1455_v34, %v1451_v32  ;;  %v1463_v47 = vld [vmem:[%s4086_s3 + $0x530] sm:$0xff] }
 0x18f   : > { %2379 = vmatpush1.bf16.msra.mxu0 %v2378_v58  ;;  %v2524_v58 = vpack.c.bf16 %v1432_v49, %v1428_v48  ;;  %v1466_v48 = vld [vmem:[%s4086_s3 + $0x548] sm:$0xff] }
 0x190   : > { %2381 = vmatprep.subr.bf16.mxu0 %v2380_v61  ;;  %v1438_v61 = vld [vmem:[%s4086_s3 + $0x468] sm:$0xff] }
 0x191   : > { %2507 = vmatpush1.bf16.msra.mxu1 %v2506_v60  ;;  %v1434_v60 = vld [vmem:[%s4086_s3 + $0x448] sm:$0xff] }
 0x192   : > { %2509 = vmatprep.subr.bf16.mxu1 %v2508_v1  ;;  %v2398_v1 = vpack.c.bf16 %v1429_v55, %v1425_v54  ;;  %v2400_v3 = vpack.c.bf16 %v1438_v61, %v1434_v60  ;;  %v1470_v49 = vld [vmem:[%s4086_s3 + $0x568] sm:$0xff]  ;;  %v2542_v54 = vpack.c.bf16 %v1463_v47, %v1459_v44  ;;  %v1471_v61 = vld [vmem:[%s4086_s3 + $0x570] sm:$0xff] }
 0x193   : > { %2383 = vmatpush1.bf16.msra.mxu0 %v2382_v10  ;;  %v1439_v10 = vld [vmem:[%s4086_s3 + $0x470] sm:$0xff]  ;;  %v2416_v55 = vpack.c.bf16 %v1470_v49, %v1466_v48  ;;  %v2546_v5 = vpack.c.bf16 %v1471_v61, %v1467_v59  ;;  %v1497_v48 = vld [vmem:[%s4086_s3 + $0x640] sm:$0xff] }
 0x194   : > { %2385 = vmatprep.subr.bf16.mxu0 %v2384_v13  ;;  %v1444_v13 = vld [vmem:[%s4086_s3 + $0x498] sm:$0xff]  ;;  %v2530_v16 = vpack.c.bf16 %v1439_v10, %v1435_v6  ;;  %v1475_v10 = vld [vmem:[%s4086_s3 + $0x590] sm:$0xff]  ;;  %v1501_v49 = vld [vmem:[%s4086_s3 + $0x660] sm:$0xff] }
 0x195   : > { %2511 = vmatpush1.bf16.msra.mxu1 %v2510_v12  ;;  %v1446_v12 = vld [vmem:[%s4086_s3 + $0x4a8] sm:$0xff]  ;;  %v2532_v21 = vpack.c.bf16 %v1448_v14, %v1444_v13  ;;  %v2434_v59 = vpack.c.bf16 %v1501_v49, %v1497_v48 }
 0x196   : > { %2513 = vmatprep.subr.bf16.mxu1 %v2512_v17  ;;  %v2404_v17 = vpack.c.bf16 %v1446_v12, %v1442_v11  ;;  %v1479_v11 = vld [vmem:[%s4086_s3 + $0x5b0] sm:$0xff]  ;;  %v1482_v13 = vld [vmem:[%s4086_s3 + $0x5c8] sm:$0xff] }
 0x197   : > { %2387 = vmatpush1.bf16.msra.mxu0 %v2386_v7  ;;  %v1450_v7 = vld [vmem:[%s4086_s3 + $0x4c8] sm:$0xff]  ;;  %v2550_v20 = vpack.c.bf16 %v1479_v11, %v1475_v10 }
 0x198   : > { %2389 = vmatprep.subr.bf16.mxu0 %v2388_v8  ;;  %v1452_v8 = vld [vmem:[%s4086_s3 + $0x4d8] sm:$0xff]  ;;  %v1486_v14 = vld [vmem:[%s4086_s3 + $0x5e8] sm:$0xff] }
 0x199   : > { %2515 = vmatpush1.bf16.msra.mxu1 %v2514_v24  ;;  %v1454_v24 = vld [vmem:[%s4086_s3 + $0x4e8] sm:$0xff]  ;;  %v2536_v33 = vpack.c.bf16 %v1456_v25, %v1452_v8 }
 0x19a   : > { %2517 = vmatprep.subr.bf16.mxu1 %v2516_v28  ;;  %v2408_v28 = vpack.c.bf16 %v1454_v24, %v1450_v7  ;;  %v1485_v7 = vld [vmem:[%s4086_s3 + $0x5e0] sm:$0xff]  ;;  %v1483_v24 = vld [vmem:[%s4086_s3 + $0x5d0] sm:$0xff] }
 0x19b   : > { %2391 = vmatpush1.bf16.msra.mxu0 %v2390_v36  ;;  %v1462_v36 = vld [vmem:[%s4086_s3 + $0x528] sm:$0xff]  ;;  %v2426_v32 = vpack.c.bf16 %v1485_v7, %v1481_v22 }
 0x19c   : > { %2393 = vmatprep.subr.bf16.mxu0 %v2392_v39  ;;  %v2410_v39 = vpack.c.bf16 %v1453_v30, %v1449_v29  ;;  %v2412_v41 = vpack.c.bf16 %v1462_v36, %v1458_v35  ;;  %v1492_v29 = vld [vmem:[%s4086_s3 + $0x618] sm:$0xff]  ;;  %v1489_v35 = vld [vmem:[%s4086_s3 + $0x600] sm:$0xff] }
 0x19d   : > { %2519 = vmatpush1.bf16.msra.mxu1 %v2518_v38  ;;  %v1464_v38 = vld [vmem:[%s4086_s3 + $0x538] sm:$0xff]  ;;  %v1493_v36 = vld [vmem:[%s4086_s3 + $0x620] sm:$0xff] }
 0x19e   : > { %2521 = vmatprep.subr.bf16.mxu1 %v2520_v43  ;;  %v1461_v43 = vld [vmem:[%s4086_s3 + $0x520] sm:$0xff]  ;;  %v2540_v46 = vpack.c.bf16 %v1464_v38, %v1460_v37  ;;  %v1496_v30 = vld [vmem:[%s4086_s3 + $0x638] sm:$0xff]  ;;  %v1491_v37 = vld [vmem:[%s4086_s3 + $0x610] sm:$0xff]  ;;  %v2430_v44 = vpack.c.bf16 %v1493_v36, %v1489_v35 }
 0x19f   : > { %2395 = vmatpush1.bf16.msra.mxu0 %v2394_v51  ;;  %v1472_v51 = vld [vmem:[%s4086_s3 + $0x578] sm:$0xff]  ;;  %v2556_v38 = vpack.c.bf16 %v1496_v30, %v1492_v29  ;;  %v1534_v29 = vld [vmem:[%s4086_s3 + $0x768] sm:$0xff]  ;;  %v1529_v36 = vld [vmem:[%s4086_s3 + $0x740] sm:$0xff] }
 0x1a0   : > { %2397 = vmatprep.subr.bf16.mxu0 %v2396_v53  ;;  %v2414_v53 = vpack.c.bf16 %v1461_v43, %v1457_v42  ;;  %v2544_v60 = vpack.c.bf16 %v1472_v51, %v1468_v50  ;;  %v1500_v42 = vld [vmem:[%s4086_s3 + $0x658] sm:$0xff]  ;;  %v1499_v50 = vld [vmem:[%s4086_s3 + $0x650] sm:$0xff] }
 0x1a1   : > { %2523 = vmatpush1.bf16.msra.mxu1 %v2522_v52  ;;  %v1283_v52 = vsub.s32 3, %v3332_v31  ;;  %v1504_v43 = vld [vmem:[%s4086_s3 + $0x678] sm:$0xff] }
 0x1a2   : > { %2525 = vmatprep.subr.bf16.mxu1 %v2524_v58  ;;  %1640 = vmatmul.mubr.f32.vlgmr.msra.gmra.mrb[0].mxu0 %v1293_v62  ;;  %v1469_v58 = vld [vmem:[%s4086_s3 + $0x560] sm:$0xff]  ;;  %v2560_v51 = vpack.c.bf16 %v1504_v43, %v1500_v42  ;;  %v1532_v30 = vld [vmem:[%s4086_s3 + $0x758] sm:$0xff]  ;;  %v1542_v42 = vld [vmem:[%s4086_s3 + $0x7a8] sm:$0xff] }
 0x1a3   : > { %2399 = vmatpush1.bf16.msra.mxu0 %v2398_v1  ;;  %v1480_v1 = vld [vmem:[%s4086_s3 + $0x5b8] sm:$0xff] }
 0x1a4   : > { %1782 = vmatmul.mubr.f32.vlgmr.msra.gmra.mrb[0].mxu1 %v1293_v62  ;;  %2401 = vmatprep.subr.bf16.mxu0 %v2400_v3  ;;  %v1474_v62 = vld [vmem:[%s4086_s3 + $0x588] sm:$0xff]  ;;  %v2418_v3 = vpack.c.bf16 %v1469_v58, %v1465_v56  ;;  %v2548_v12 = vpack.c.bf16 %v1480_v1, %v1476_v0  ;;  %v1508_v56 = vld [vmem:[%s4086_s3 + $0x698] sm:$0xff]  ;;  %v1507_v0 = vld [vmem:[%s4086_s3 + $0x690] sm:$0xff] }
 0x1a5   : > { %2527 = vmatpush1.bf16.msra.mxu1 %v2526_v2  ;;  %v1284_v2 = vrot.slane %v3386_v57, %v1283_v52  ;;  %v2420_v6 = vpack.c.bf16 %v1478_v63, %v1474_v62  ;;  %v1512_v58 = vld [vmem:[%s4086_s3 + $0x6b8] sm:$0xff]  ;;  %v1505_v62 = vld [vmem:[%s4086_s3 + $0x680] sm:$0xff] }
 0x1a6   : > { %2529 = vmatprep.subr.bf16.mxu1 %v2528_v9  ;;  %v1477_v9 = vld [vmem:[%s4086_s3 + $0x5a0] sm:$0xff]  ;;  %v2564_v1 = vpack.c.bf16 %v1512_v58, %v1508_v56  ;;  %v1540_v43 = vld [vmem:[%s4086_s3 + $0x798] sm:$0xff]  ;;  %v1546_v56 = vld [vmem:[%s4086_s3 + $0x7c8] sm:$0xff] }
 0x1a7   : > { %2403 = vmatpush1.bf16.msra.mxu0 %v2402_v15  ;;  %v1266_v15 = vld [vmem:[#allocation2 + $0x18] sm:$0xff]  ;;  %v2422_v19 = vpack.c.bf16 %v1477_v9, %v1473_v4  ;;  %v1509_v63 = vld [vmem:[%s4086_s3 + $0x6a0] sm:$0xff]  ;;  %v1518_v4 = vld [vmem:[%s4086_s3 + $0x6e8] sm:$0xff] }
 0x1a8   : > { %2405 = vmatprep.subr.bf16.mxu0 %v2404_v17  ;;  %v1488_v17 = vld [vmem:[%s4086_s3 + $0x5f8] sm:$0xff]  ;;  %v1292_v18 = vadd.f32 %v1284_v2, %v1266_v15  ;;  %v1511_v2 = vld [vmem:[%s4086_s3 + $0x6b0] sm:$0xff]  ;;  %v2438_v9 = vpack.c.bf16 %v1509_v63, %v1505_v62  ;;  %v1550_v58 = vld [vmem:[%s4086_s3 + $0x7e8] sm:$0xff] }
 0x1a9   : > { %2531 = vmatpush1.bf16.msra.mxu1 %v2530_v16  ;;  %v1484_v16 = vld [vmem:[%s4086_s3 + $0x5d8] sm:$0xff]  ;;  %v2566_v10 = vpack.c.bf16 %v1511_v2, %v1507_v0  ;;  %v1265_v63 = vld [vmem:[#allocation2 + $0x10] sm:$0xff]  ;;  %v1545_v2 = vld [vmem:[%s4086_s3 + $0x7c0] sm:$0xff] }
 0x1aa   : > { %2533 = vmatprep.subr.bf16.mxu1 %v2532_v21  ;;  %v2424_v21 = vpack.c.bf16 %v1486_v14, %v1482_v13  ;;  %v1296_v8 = vmax.f32 %v1292_v18, 0.0  ;;  %v2552_v25 = vpack.c.bf16 %v1488_v17, %v1484_v16  ;;  %v1517_v13 = vld [vmem:[%s4086_s3 + $0x6e0] sm:$0xff]  ;;  %v1515_v14 = vld [vmem:[%s4086_s3 + $0x6d0] sm:$0xff]  ;;  %v1522_v17 = vld [vmem:[%s4086_s3 + $0x708] sm:$0xff] }
 0x1ab   : > { %2407 = vmatpush1.bf16.msra.mxu0 %v2406_v26  ;;  %v1487_v26 = vld [vmem:[%s4086_s3 + $0x5f0] sm:$0xff]  ;;  %v1526_v18 = vld [vmem:[%s4086_s3 + $0x728] sm:$0xff] }
 0x1ac   : > { %2409 = vmatprep.subr.bf16.mxu0 %v2408_v28  ;;  %v1494_v28 = vld [vmem:[%s4086_s3 + $0x628] sm:$0xff]  ;;  %1710 = vmatprep.mubr.f32.mxu0 %v1296_v8  ;;  %v1519_v16 = vld [vmem:[%s4086_s3 + $0x6f0] sm:$0xff]  ;;  %v2444_v7 = vpack.c.bf16 %v1526_v18, %v1522_v17  ;;  %v1895_v18 = vld [vmem:[%s4088_s5 + $0x100] sm:$0xff] }
 0x1ad   : > { %2535 = vmatpush1.bf16.msra.mxu1 %v2534_v27  ;;  %v1490_v27 = vld [vmem:[%s4086_s3 + $0x608] sm:$0xff]  ;;  %1852 = vmatprep.mubr.f32.mxu1 %v1296_v8  ;;  %v2570_v22 = vpack.c.bf16 %v1519_v16, %v1515_v14  ;;  %v1525_v8 = vld [vmem:[%s4086_s3 + $0x720] sm:$0xff] }
 0x1ae   : > { %2537 = vmatprep.subr.bf16.mxu1 %v2536_v33  ;;  %v2554_v33 = vpack.c.bf16 %v1487_v26, %v1483_v24  ;;  %v2428_v34 = vpack.c.bf16 %v1494_v28, %v1490_v27  ;;  %v1521_v24 = vld [vmem:[%s4086_s3 + $0x700] sm:$0xff]  ;;  %v1527_v27 = vld [vmem:[%s4086_s3 + $0x730] sm:$0xff]  ;;  %v1530_v28 = vld [vmem:[%s4086_s3 + $0x748] sm:$0xff] }
 0x1af   : > { %2411 = vmatpush1.bf16.msra.mxu0 %v2410_v39  ;;  %v1495_v39 = vld [vmem:[%s4086_s3 + $0x630] sm:$0xff]  ;;  %v2448_v35 = vpack.c.bf16 %v1534_v29, %v1530_v28  ;;  %v1863_v16 = vld [vmem:[%s4088_s5] sm:$0xff]  ;;  %v1864_v17 = vld [vmem:[%s4088_s5 + $0x8] sm:$0xff] }
 0x1b0   : > { %2413 = vmatprep.subr.bf16.mxu0 %v2412_v41  ;;  %v1502_v41 = vld [vmem:[%s4086_s3 + $0x668] sm:$0xff]  ;;  %v1865_v28 = vld [vmem:[%s4088_s5 + $0x10] sm:$0xff]  ;;  %v1866_v29 = vld [vmem:[%s4088_s5 + $0x18] sm:$0xff] }
 0x1b1   : > { %2539 = vmatpush1.bf16.msra.mxu1 %v2538_v40  ;;  %v1498_v40 = vld [vmem:[%s4086_s3 + $0x648] sm:$0xff] }
 0x1b2   : > { %2541 = vmatprep.subr.bf16.mxu1 %v2540_v46  ;;  %v2558_v46 = vpack.c.bf16 %v1495_v39, %v1491_v37  ;;  %v2432_v47 = vpack.c.bf16 %v1502_v41, %v1498_v40  ;;  %v1533_v37 = vld [vmem:[%s4086_s3 + $0x760] sm:$0xff]  ;;  %v1535_v40 = vld [vmem:[%s4086_s3 + $0x770] sm:$0xff]  ;;  %v1538_v41 = vld [vmem:[%s4086_s3 + $0x788] sm:$0xff] }
 0x1b3   : > { %2415 = vmatpush1.bf16.msra.mxu0 %v2414_v53  ;;  %v1503_v53 = vld [vmem:[%s4086_s3 + $0x670] sm:$0xff]  ;;  %v2452_v49 = vpack.c.bf16 %v1542_v42, %v1538_v41  ;;  %v1867_v41 = vld [vmem:[%s4088_s5 + $0x20] sm:$0xff]  ;;  %v1868_v42 = vld [vmem:[%s4088_s5 + $0x28] sm:$0xff] }
 0x1b4   : > { %2417 = vmatprep.subr.bf16.mxu0 %v2416_v55  ;;  %v1510_v55 = vld [vmem:[%s4086_s3 + $0x6a8] sm:$0xff] }
 0x1b5   : > { %2543 = vmatpush1.bf16.msra.mxu1 %v2542_v54  ;;  %v1506_v54 = vld [vmem:[%s4086_s3 + $0x688] sm:$0xff] }
 0x1b6   : > { %2545 = vmatprep.subr.bf16.mxu1 %v2544_v60  ;;  %v2562_v60 = vpack.c.bf16 %v1503_v53, %v1499_v50  ;;  %v2436_v61 = vpack.c.bf16 %v1510_v55, %v1506_v54  ;;  %v1537_v50 = vld [vmem:[%s4086_s3 + $0x780] sm:$0xff]  ;;  %v1539_v53 = vld [vmem:[%s4086_s3 + $0x790] sm:$0xff] }
 0x1b7   : > { %2419 = vmatpush1.bf16.msra.mxu0 %v2418_v3  ;;  %v1514_v3 = vld [vmem:[%s4086_s3 + $0x6c8] sm:$0xff]  ;;  %v1543_v55 = vld [vmem:[%s4086_s3 + $0x7b0] sm:$0xff] }
 0x1b8   : > { %2421 = vmatprep.subr.bf16.mxu0 %v2420_v6  ;;  %v1520_v6 = vld [vmem:[%s4086_s3 + $0x6f8] sm:$0xff]  ;;  %v2440_v11 = vpack.c.bf16 %v1518_v4, %v1514_v3  ;;  %v2582_v0 = vpack.c.bf16 %v1543_v55, %v1539_v53  ;;  %v1549_v3 = vld [vmem:[%s4086_s3 + $0x7e0] sm:$0xff]  ;;  %v1547_v4 = vld [vmem:[%s4086_s3 + $0x7d0] sm:$0xff]  ;;  %v2598_v53 = vpack.c.bf16 %v1868_v42, %v1867_v41 }
 0x1b9   : > { %2547 = vmatpush1.bf16.msra.mxu1 %v2546_v5  ;;  %v1516_v5 = vld [vmem:[%s4086_s3 + $0x6d8] sm:$0xff]  ;;  %v1877_v42 = vld [vmem:[%s4088_s5 + $0x70] sm:$0xff] }
 0x1ba   : > { %2549 = vmatprep.subr.bf16.mxu1 %v2548_v12  ;;  %v1513_v12 = vld [vmem:[%s4086_s3 + $0x6c0] sm:$0xff]  ;;  %v2568_v15 = vpack.c.bf16 %v1520_v6, %v1516_v5  ;;  %v1551_v5 = vld [vmem:[%s4086_s3 + $0x7f0] sm:$0xff]  ;;  %v1926_v41 = vld [vmem:[%s4088_s5 + $0x1f8] sm:$0xff] }
 0x1bb   : > { %2423 = vmatpush1.bf16.msra.mxu0 %v2422_v19  ;;  %v1524_v19 = vld [vmem:[%s4086_s3 + $0x718] sm:$0xff]  ;;  %v1879_v6 = vld [vmem:[%s4088_s5 + $0x80] sm:$0xff]  ;;  %v2586_v14 = vpack.c.bf16 %v1551_v5, %v1547_v4  ;;  %v1872_v5 = vld [vmem:[%s4088_s5 + $0x48] sm:$0xff] }
 0x1bc   : > { %2425 = vmatprep.subr.bf16.mxu0 %v2424_v21  ;;  %v2442_v21 = vpack.c.bf16 %v1517_v13, %v1513_v12  ;;  %v1912_v12 = vld [vmem:[%s4088_s5 + $0x188] sm:$0xff]  ;;  %v2458_v13 = vpack.c.bf16 %v1549_v3, %v1545_v2 }
 0x1bd   : > { %2551 = vmatpush1.bf16.msra.mxu1 %v2550_v20  ;;  %v1528_v20 = vld [vmem:[%s4086_s3 + $0x738] sm:$0xff] }
 0x1be   : > { %2553 = vmatprep.subr.bf16.mxu1 %v2552_v25  ;;  %v1523_v25 = vld [vmem:[%s4086_s3 + $0x710] sm:$0xff]  ;;  %v2572_v26 = vpack.c.bf16 %v1528_v20, %v1524_v19  ;;  %v1896_v20 = vld [vmem:[%s4088_s5 + $0x108] sm:$0xff] }
 0x1bf   : > { %2427 = vmatpush1.bf16.msra.mxu0 %v2426_v32  ;;  %v1536_v32 = vld [vmem:[%s4086_s3 + $0x778] sm:$0xff] }
 0x1c0   : > { %2429 = vmatprep.subr.bf16.mxu0 %v2428_v34  ;;  %v2574_v34 = vpack.c.bf16 %v1527_v27, %v1523_v25  ;;  %v2576_v39 = vpack.c.bf16 %v1536_v32, %v1532_v30  ;;  %v2590_v25 = vpack.c.bf16 %v1864_v17, %v1863_v16  ;;  %v1897_v30 = vld [vmem:[%s4088_s5 + $0x110] sm:$0xff] }
 0x1c1   : > { %2555 = vmatpush1.bf16.msra.mxu1 %v2554_v33  ;;  %v2446_v33 = vpack.c.bf16 %v1525_v8, %v1521_v24  ;;  %v1913_v24 = vld [vmem:[%s4088_s5 + $0x190] sm:$0xff]  ;;  %v1914_v8 = vld [vmem:[%s4088_s5 + $0x198] sm:$0xff] }
 0x1c2   : > { %2557 = vmatprep.subr.bf16.mxu1 %v2556_v38  ;;  %v1531_v38 = vld [vmem:[%s4086_s3 + $0x750] sm:$0xff]  ;;  %v2624_v32 = vpack.c.bf16 %v1914_v8, %v1913_v24  ;;  %v1892_v24 = vld [vmem:[%s4088_s5 + $0xe8] sm:$0xff]  ;;  %v1923_v8 = vld [vmem:[%s4088_s5 + $0x1e0] sm:$0xff] }
 0x1c3   : > { %2431 = vmatpush1.bf16.msra.mxu0 %v2430_v44  ;;  %v1544_v44 = vld [vmem:[%s4086_s3 + $0x7b8] sm:$0xff]  ;;  %v2578_v48 = vpack.c.bf16 %v1535_v40, %v1531_v38  ;;  %v2594_v38 = vpack.c.bf16 %v1866_v29, %v1865_v28 }
 0x1c4   : > { %2433 = vmatprep.subr.bf16.mxu0 %v2432_v47  ;;  %v2450_v47 = vpack.c.bf16 %v1533_v37, %v1529_v36  ;;  %v2580_v54 = vpack.c.bf16 %v1544_v44, %v1540_v43  ;;  %v1915_v36 = vld [vmem:[%s4088_s5 + $0x1a0] sm:$0xff]  ;;  %v1916_v37 = vld [vmem:[%s4088_s5 + $0x1a8] sm:$0xff] }
 0x1c5   : > { %2559 = vmatpush1.bf16.msra.mxu1 %v2558_v46  ;;  %v1279_v46 = vsub.s32 2, %v3332_v31  ;;  %v1899_v43 = vld [vmem:[%s4088_s5 + $0x120] sm:$0xff]  ;;  %v2628_v44 = vpack.c.bf16 %v1916_v37, %v1915_v36  ;;  %v1893_v37 = vld [vmem:[%s4088_s5 + $0xf0] sm:$0xff] }
 0x1c6   : > { %2561 = vmatprep.subr.bf16.mxu1 %v2560_v51  ;;  %v1541_v51 = vld [vmem:[%s4086_s3 + $0x7a0] sm:$0xff] }
 0x1c7   : > { %2435 = vmatpush1.bf16.msra.mxu0 %v2434_v59  ;;  %v1548_v59 = vld [vmem:[%s4086_s3 + $0x7d8] sm:$0xff]  ;;  %v2454_v62 = vpack.c.bf16 %v1541_v51, %v1537_v50  ;;  %v1917_v50 = vld [vmem:[%s4088_s5 + $0x1b0] sm:$0xff]  ;;  %v2258_v31 = vld [vmem:[%s4089_s6] ss:$0 sm:$0xff] }
 0x1c8   : > { %2437 = vmatprep.subr.bf16.mxu0 %v2436_v61  ;;  %v1280_v61 = vrot.slane %v3386_v57, %v1279_v46  ;;  %v1918_v51 = vld [vmem:[%s4088_s5 + $0x1b8] sm:$0xff] }
 0x1c9   : > { %2563 = vmatpush1.bf16.msra.mxu1 %v2562_v60  ;;  %v1552_v60 = vld [vmem:[%s4086_s3 + $0x7f8] sm:$0xff] }
 0x1ca   : > { %2565 = vmatprep.subr.bf16.mxu1 %v2564_v1  ;;  %v2456_v1 = vpack.c.bf16 %v1550_v58, %v1546_v56  ;;  %v2584_v57 = vpack.c.bf16 %v1552_v60, %v1548_v59  ;;  %v1869_v56 = vld [vmem:[%s4088_s5 + $0x30] sm:$0xff]  ;;  %v1870_v58 = vld [vmem:[%s4088_s5 + $0x38] sm:$0xff]  ;;  %v2632_v60 = vpack.c.bf16 %v1918_v51, %v1917_v50  ;;  %v1553_v51 = vld [vmem:[%s4087_s4] sm:$0xf] }
 0x1cb   : > { %2439 = vmatpush1.bf16.msra.mxu0 %v2438_v9  ;;  %v1880_v9 = vld [vmem:[%s4088_s5 + $0x88] sm:$0xff]  ;;  %v1901_v59 = vld [vmem:[%s4088_s5 + $0x130] sm:$0xff]  ;;  %v2602_v2 = vpack.c.bf16 %v1870_v58, %v1869_v56  ;;  %v1570_v56 = vrot.slane %v1553_v51, %v1283_v52 }
 0x1cc   : > { %2441 = vmatprep.subr.bf16.mxu0 %v2440_v11  ;;  %v1911_v11 = vld [vmem:[%s4088_s5 + $0x180] sm:$0xff] }
 0x1cd   : > { %2567 = vmatpush1.bf16.msra.mxu1 %v2566_v10  ;;  %v1291_v10 = vadd.f32 %v1280_v61, %v1265_v63  ;;  %v2620_v19 = vpack.c.bf16 %v1912_v12, %v1911_v11  ;;  %v1902_v61 = vld [vmem:[%s4088_s5 + $0x138] sm:$0xff]  ;;  %v1888_v63 = vld [vmem:[%s4088_s5 + $0xc8] sm:$0xff]  ;;  %v1889_v11 = vld [vmem:[%s4088_s5 + $0xd0] sm:$0xff] }
 0x1ce   : > { %2569 = vmatprep.subr.bf16.mxu1 %v2568_v15  ;;  %v2588_v15 = vpack.c.bf16 %v1880_v9, %v1879_v6  ;;  %v2634_v3 = vpack.c.bf16 %v1902_v61, %v1901_v59  ;;  %v1903_v6 = vld [vmem:[%s4088_s5 + $0x140] sm:$0xff]  ;;  %v1890_v12 = vld [vmem:[%s4088_s5 + $0xd8] sm:$0xff] }
 0x1cf   : > { %2443 = vmatpush1.bf16.msra.mxu0 %v2442_v21  ;;  %v1881_v21 = vld [vmem:[%s4088_s5 + $0x90] sm:$0xff]  ;;  %v2608_v17 = vpack.c.bf16 %v1890_v12, %v1889_v11 }
 0x1d0   : > { %2445 = vmatprep.subr.bf16.mxu0 %v2444_v7  ;;  %v1295_v7 = vmax.f32 %v1291_v10, 0.0  ;;  %v1904_v10 = vld [vmem:[%s4088_s5 + $0x148] sm:$0xff] }
 0x1d1   : > { %2571 = vmatpush1.bf16.msra.mxu1 %v2570_v22  ;;  %v1882_v22 = vld [vmem:[%s4088_s5 + $0x98] sm:$0xff]  ;;  %v2638_v16 = vpack.c.bf16 %v1904_v10, %v1903_v6 }
 0x1d2   : > { %2573 = vmatprep.subr.bf16.mxu1 %v2572_v26  ;;  %v2622_v26 = vpack.c.bf16 %v1896_v20, %v1895_v18  ;;  %v2592_v27 = vpack.c.bf16 %v1882_v22, %v1881_v21  ;;  %v1873_v18 = vld [vmem:[%s4088_s5 + $0x50] sm:$0xff]  ;;  %v1906_v22 = vld [vmem:[%s4088_s5 + $0x158] sm:$0xff] }
 0x1d3   : > { %2447 = vmatpush1.bf16.msra.mxu0 %v2446_v33  ;;  %v1898_v33 = vld [vmem:[%s4088_s5 + $0x118] sm:$0xff]  ;;  %v1905_v20 = vld [vmem:[%s4088_s5 + $0x150] sm:$0xff] }
 0x1d4   : > { %2449 = vmatprep.subr.bf16.mxu0 %v2448_v35  ;;  %v1884_v35 = vld [vmem:[%s4088_s5 + $0xa8] sm:$0xff] }
 0x1d5   : > { %2575 = vmatpush1.bf16.msra.mxu1 %v2574_v34  ;;  %v1883_v34 = vld [vmem:[%s4088_s5 + $0xa0] sm:$0xff] }
 0x1d6   : > { %2577 = vmatprep.subr.bf16.mxu1 %v2576_v39  ;;  %v2626_v39 = vpack.c.bf16 %v1898_v33, %v1897_v30  ;;  %v2596_v40 = vpack.c.bf16 %v1884_v35, %v1883_v34  ;;  %v1875_v30 = vld [vmem:[%s4088_s5 + $0x60] sm:$0xff]  ;;  %v1908_v35 = vld [vmem:[%s4088_s5 + $0x168] sm:$0xff] }
 0x1d7   : > { %2451 = vmatpush1.bf16.msra.mxu0 %v2450_v47  ;;  %v1900_v47 = vld [vmem:[%s4088_s5 + $0x128] sm:$0xff]  ;;  %v1907_v33 = vld [vmem:[%s4088_s5 + $0x160] sm:$0xff] }
 0x1d8   : > { %2453 = vmatprep.subr.bf16.mxu0 %v2452_v49  ;;  %v1886_v49 = vld [vmem:[%s4088_s5 + $0xb8] sm:$0xff]  ;;  %v2646_v36 = vpack.c.bf16 %v1908_v35, %v1907_v33 }
 0x1d9   : > { %2579 = vmatpush1.bf16.msra.mxu1 %v2578_v48  ;;  %v1885_v48 = vld [vmem:[%s4088_s5 + $0xb0] sm:$0xff] }
 0x1da   : > { %2581 = vmatprep.subr.bf16.mxu1 %v2580_v54  ;;  %v2630_v54 = vpack.c.bf16 %v1900_v47, %v1899_v43  ;;  %v2600_v55 = vpack.c.bf16 %v1886_v49, %v1885_v48  ;;  %v1878_v43 = vld [vmem:[%s4088_s5 + $0x78] sm:$0xff]  ;;  %v1909_v48 = vld [vmem:[%s4088_s5 + $0x170] sm:$0xff] }
 0x1db   : > { %2455 = vmatpush1.bf16.msra.mxu0 %v2454_v62  ;;  %v1887_v62 = vld [vmem:[%s4088_s5 + $0xc0] sm:$0xff]  ;;  %v2618_v47 = vpack.c.bf16 %v1878_v43, %v1877_v42  ;;  %v1910_v49 = vld [vmem:[%s4088_s5 + $0x178] sm:$0xff] }
 0x1dc   : > { %2457 = vmatprep.subr.bf16.mxu0 %v2456_v1  ;;  %v1920_v1 = vld [vmem:[%s4088_s5 + $0x1c8] sm:$0xff]  ;;  %v2604_v4 = vpack.c.bf16 %v1888_v63, %v1887_v62  ;;  %v2650_v50 = vpack.c.bf16 %v1910_v49, %v1909_v48 }
 0x1dd   : > { %2583 = vmatpush1.bf16.msra.mxu1 %v2582_v0  ;;  %v1919_v0 = vld [vmem:[%s4088_s5 + $0x1c0] sm:$0xff] }
 0x1de   : > { %2585 = vmatprep.subr.bf16.mxu1 %v2584_v57  ;;  %v1871_v57 = vld [vmem:[%s4088_s5 + $0x40] sm:$0xff]  ;;  %v2636_v9 = vpack.c.bf16 %v1920_v1, %v1919_v0 }
 0x1df   : > { %2459 = vmatpush1.bf16.msra.mxu0 %v2458_v13  ;;  %v1921_v13 = vld [vmem:[%s4088_s5 + $0x1d0] sm:$0xff] }
 0x1e0   : > { %2589 = vmatprep.subr.bf16.mxu0 %v2588_v15  ;;  %v2606_v15 = vpack.c.bf16 %v1872_v5, %v1871_v57 }
 0x1e1   : > { %2587 = vmatpush1.bf16.msra.mxu1 %v2586_v14  ;;  %v1922_v14 = vld [vmem:[%s4088_s5 + $0x1d8] sm:$0xff] }
 0x1e2   : > { %2621 = vmatprep.subr.bf16.mxu1 %v2620_v19  ;;  %1711 = vmatmul.mubr.f32.vlgmr.msra.gmra.mrb[0].mxu0 %v1295_v7  ;;  %v1874_v19 = vld [vmem:[%s4088_s5 + $0x58] sm:$0xff]  ;;  %v2640_v21 = vpack.c.bf16 %v1922_v14, %v1921_v13 }
 0x1e3   : > { %2591 = vmatpush3.bf16.msra.mxu0 %v2590_v25  ;;  %v1924_v25 = vld [vmem:[%s4088_s5 + $0x1e8] sm:$0xff] }
 0x1e4   : > { %1853 = vmatmul.mubr.f32.vlgmr.msra.gmra.mrb[0].mxu1 %v1295_v7  ;;  %2593 = vmatprep.subr.bf16.mxu0 %v2592_v27  ;;  %v1891_v7 = vld [vmem:[%s4088_s5 + $0xe0] sm:$0xff]  ;;  %v2642_v27 = vpack.c.bf16 %v1906_v22, %v1905_v20  ;;  %v2644_v29 = vpack.c.bf16 %v1924_v25, %v1923_v8 }
 0x1e5   : > { %2623 = vmatpush3.bf16.msra.mxu1 %v2622_v26  ;;  %v2610_v26 = vpack.c.bf16 %v1874_v19, %v1873_v18  ;;  %v2612_v28 = vpack.c.bf16 %v1892_v24, %v1891_v7 }
 0x1e6   : > { %2625 = vmatprep.subr.bf16.mxu1 %v2624_v32  ;;  %v1876_v32 = vld [vmem:[%s4088_s5 + $0x68] sm:$0xff] }
 0x1e7   : > { %2595 = vmatpush3.bf16.msra.mxu0 %v2594_v38  ;;  %v2614_v34 = vpack.c.bf16 %v1876_v32, %v1875_v30  ;;  %v1894_v38 = vld [vmem:[%s4088_s5 + $0xf8] sm:$0xff] }
 0x1e8   : > { %2597 = vmatprep.subr.bf16.mxu0 %v2596_v40  ;;  %v2616_v40 = vpack.c.bf16 %v1894_v38, %v1893_v37 }
 0x1e9   : > { %2627 = vmatpush3.bf16.msra.mxu1 %v2626_v39  ;;  %v1925_v39 = vld [vmem:[%s4088_s5 + $0x1f0] sm:$0xff] }
 0x1ea   : > { %2629 = vmatprep.subr.bf16.mxu1 %v2628_v44  ;;  %v2648_v44 = vpack.c.bf16 %v1926_v41, %v1925_v39 }
 0x1eb   : > { %2599 = vmatpush3.bf16.msra.mxu0 %v2598_v53  ;;  %v1558_v53 = vrot.slane %v1553_v51, %v1271_v23 }
 0x1ec   : > { %2601 = vmatprep.subr.bf16.mxu0 %v2600_v55  ;;  %v1562_v55 = vrot.slane %v1553_v51, %v1275_v45 }
 0x1ed   : > { %2631 = vmatpush3.bf16.msra.mxu1 %v2630_v54  ;;  %v1566_v54 = vrot.slane %v1553_v51, %v1279_v46 }
 0x1ee   : > { %2633 = vmatprep.subr.bf16.mxu1 %v2632_v60 }
 0x1ef   : > { %2603 = vmatpush3.bf16.msra.mxu0 %v2602_v2 }
 0x1f0   : > { %2605 = vmatprep.subr.bf16.mxu0 %v2604_v4 }
 0x1f1   : > { %2635 = vmatpush3.bf16.msra.mxu1 %v2634_v3 }
 0x1f2   : > { %2637 = vmatprep.subr.bf16.mxu1 %v2636_v9 }
 0x1f3   : > { %2607 = vmatpush3.bf16.msra.mxu0 %v2606_v15 }
 0x1f4   : > { %2609 = vmatprep.subr.bf16.mxu0 %v2608_v17 }
 0x1f5   : > { %2639 = vmatpush3.bf16.msra.mxu1 %v2638_v16 }
 0x1f6   : > { %2641 = vmatprep.subr.bf16.mxu1 %v2640_v21 }
 0x1f7   : > { %2611 = vmatpush3.bf16.msra.mxu0 %v2610_v26 }
 0x1f8   : > { %2613 = vmatprep.subr.bf16.mxu0 %v2612_v28 }
 0x1f9   : > { %2643 = vmatpush3.bf16.msra.mxu1 %v2642_v27 }
 0x1fa   : > { %2645 = vmatprep.subr.bf16.mxu1 %v2644_v29 }
 0x1fb   : > { %2615 = vmatpush3.bf16.msra.mxu0 %v2614_v34 }
 0x1fc   : > { %2617 = vmatprep.subr.bf16.mxu0 %v2616_v40 }
 0x1fd   : > { %2647 = vmatpush3.bf16.msra.mxu1 %v2646_v36 }
 0x1fe   : > { %2649 = vmatprep.subr.bf16.mxu1 %v2648_v44 }
 0x1ff   : > { %2619 = vmatpush3.bf16.msra.mxu0 %v2618_v47 }
 0x201   : > { %2651 = vmatpush3.bf16.msra.mxu1 %v2650_v50 }
 0x2b5   : > { %v1712_v58 = vpop.f32.mrb[0].mxu0 }
 0x2b6   : > { %v2652_v59 = vadd.f32 %v1712_v58, %v1558_v53  ;;  %v1714_v61 = vpop.f32.mrb[1].mxu0 }
 0x2b7   : > { %v1854_v60 = vpop.f32.mrb[0].mxu1  ;;  %v2653_v63 = vadd.f32 %v1714_v61, %v1562_v55 }
 0x2b8   : > { %v2654_v62 = vadd.f32 %v1854_v60, %v1566_v54  ;;  %v1856_v0 = vpop.f32.mrb[1].mxu1  ;;  %v1859_v3 = vmax.f32 %v2652_v59, 0.0 }
 0x2b9   : > { %v2655_v1 = vadd.f32 %v1856_v0, %v1570_v56  ;;  %v1860_v2 = vmax.f32 %v2653_v63, 0.0 }
 0x2ba   : > { %v1861_v4 = vmax.f32 %v2654_v62, 0.0 }
 0x2bb   : > { %v1862_v23 = vmax.f32 %v2655_v1, 0.0  ;;  %1998 = vmatprep.mubr.f32.mxu0 %v1860_v2 }
 0x2bc   : > { %1999 = vmatmul.mubr.f32.vlgmr.msra.gmra.mrb[2].mxu0 %v1859_v3 }
 0x2bd   : > { %2068 = vmatprep.mubr.f32.mxu1 %v1862_v23 }
 0x2be   : > { %2069 = vmatmul.mubr.f32.vlgmr.msra.gmra.mrb[2].mxu1 %v1861_v4 }
 0x38f   : > { %v2294_v45 = vpop.f32.mrb[2].mxu0 }
 0x390   : > { %v2295_v52 = vpop.f32.mrb[3].mxu0 }
 0x391   : > { %v2329_v46 = vpop.f32.mrb[2].mxu1  ;;  %v2296_v57 = vadd.f32 %v2295_v52, %v2294_v45 }
 0x392   : > { %v2330_v5 = vpop.f32.mrb[3].mxu1 }
 0x393   : > { %v2331_v6 = vadd.f32 %v2330_v5, %v2329_v46  ;;  %v2001_v9 = vadd.f32 %v2296_v57, %v2258_v31 }
 0x395   : > { %v2071_v10 = vadd.f32 %v2331_v6, %v2001_v9 }
 0x397   : > { %2074 = vst [vmem:[%s4090_s7] sm:$0xff] %v2071_v10 }
 0x398 PF: > { %s17_s24 = sadd.s32 1, %s2871_s24  }
 0x399   : > { %p14_p7 = scmp.ge.s32.totalorder %s17_s24, 4  }
 0x39b   :  { %16 = sbr.rel (!%p14_p7) target bundleno = 1 (0x1), region = 85 }

</bundles_post_ra>
